<compile_context>
chip_gen: v7x
topology: tpu7x:2x2x1
jax: 0.10.0
libtpu: 0.0.40
codegen_flags: <defaults>
</compile_context>

<pallas_src>
import functools

import jax
import jax.numpy as jnp
from jax.experimental import pallas as pl
from jax.experimental.pallas import tpu as pltpu

BN_EPS = 1e-5      # nn.BatchNorm1d default eps
COS_EPS = 1e-8     # F.cosine_similarity default eps
LANE_PAD = 128     # pad all MLP feature dims to a full lane width


# ----------------------------------------------------------------------------
# Kernel helpers
# ----------------------------------------------------------------------------
def _linear_bf16(h, w_ref, b_ref):
    """MXU matmul with bf16 operands, f32 accumulation, f32 bias add."""
    return (jnp.dot(h.astype(jnp.bfloat16), w_ref[...],
                    preferred_element_type=jnp.float32) + b_ref[...])


def _bn_per_view(y, g_ref, be_ref, n_per_view, relu):
    """BatchNorm1d (training-mode biased batch stats) per stacked view.

    y is (2N, D) with rows [view1; view2].  The (2N,D)->(2,N,D) reshape is
    layout-free when N % 8 == 0 (f32 sublane tile), so per-view statistics are
    a plain axis-1 reduce -- no per-view slice + concatenate."""
    d_feat = y.shape[-1]
    y3 = y.reshape(2, n_per_view, d_feat)
    mu = jnp.mean(y3, axis=1, keepdims=True)
    d = y3 - mu
    var = jnp.mean(d * d, axis=1, keepdims=True)
    out = g_ref[...] * (d * jax.lax.rsqrt(var + BN_EPS)) + be_ref[...]
    out = out.reshape(2 * n_per_view, d_feat)
    if relu:
        out = jnp.maximum(out, 0.0)
    return out


def _cos_row_sum(p_v, z_v):
    """Sum over rows of cosine_similarity(p_v, z_v) with PyTorch eps
    semantics: rsqrt(max(||.||^2, eps^2)) == 1 / max(||.||, eps)."""
    eps2 = jnp.float32(COS_EPS * COS_EPS)
    dots = jnp.sum(p_v * z_v, axis=-1, keepdims=True)
    inv_pn = jax.lax.rsqrt(jnp.maximum(jnp.sum(p_v * p_v, axis=-1, keepdims=True), eps2))
    inv_zn = jax.lax.rsqrt(jnp.maximum(jnp.sum(z_v * z_v, axis=-1, keepdims=True), eps2))
    return jnp.sum(dots * inv_pn * inv_zn, axis=0, keepdims=True)   # (1, 1)


# ----------------------------------------------------------------------------
# Fused Pallas kernel: streamed GAP + backbone fc + MLPs + loss epilogue
# ----------------------------------------------------------------------------
def _simsiam_fused_kernel(x1_ref, x2_ref,
                          wbb_ref, bbb_ref,
                          w1_ref, b1_ref, g1_ref, be1_ref,
                          w2_ref, b2_ref, g2_ref, be2_ref,
                          w3_ref, b3_ref, g3_ref, be3_ref,
                          wp1_ref, bp1_ref, gp1_ref, bep1_ref,
                          wp2_ref, bp2_ref,
                          o_ref,
                          feats_ref,
                          *, n_per_view, hw_total):
    n = n_per_view
    k = pl.program_id(0)

    @pl.when(k == 0)
    def _init():
        feats_ref[...] = jnp.zeros_like(feats_ref)

    # Streamed GAP: partial sum of this H*W chunk (XLU minor-axis reduce),
    # accumulated per view into the (2N, C) f32 scratch (sublane-aligned).
    feats_ref[pl.ds(0, n), :] += jnp.sum(x1_ref[...], axis=-1)
    feats_ref[pl.ds(n, n), :] += jnp.sum(x2_ref[...], axis=-1)

    @pl.when(k == pl.num_programs(0) - 1)
    def _epilogue():
        feats = feats_ref[...] * jnp.float32(1.0 / hw_total)        # (2N, C)

        # backbone stand-in fc: true (C, feat) weight (GAP no longer folded in)
        h = jnp.dot(feats, wbb_ref[...],
                    preferred_element_type=jnp.float32) + bbb_ref[...]

        # projection_MLP: (Linear -> BN -> ReLU) x2  +  (Linear -> BN)
        h = _bn_per_view(_linear_bf16(h, w1_ref, b1_ref), g1_ref, be1_ref, n, relu=True)
        h = _bn_per_view(_linear_bf16(h, w2_ref, b2_ref), g2_ref, be2_ref, n, relu=True)
        z = _bn_per_view(_linear_bf16(h, w3_ref, b3_ref), g3_ref, be3_ref, n, relu=False)

        # prediction_MLP: Linear -> BN -> ReLU -> Linear
        p = _bn_per_view(_linear_bf16(z, wp1_ref, bp1_ref), gp1_ref, bep1_ref, n, relu=True)
        p = _linear_bf16(p, wp2_ref, bp2_ref)                       # (2N, 128)

        # L = D(p1, z2)/2 + D(p2, z1)/2 (z.detach() is a no-op forward-only).
        # The view halves are static, sublane-aligned vreg selections, so no
        # concat / roll is needed for the swap.
        z1v, z2v = z[:n], z[n:]
        p1v, p2v = p[:n], p[n:]
        total = _cos_row_sum(p1v, z2v) + _cos_row_sum(p2v, z1v)     # (1, 1)
        loss = -total * jnp.float32(1.0 / (2 * n))
        # lane-dense, fully unmasked (8,128) store; wrapper reads [0, 0]
        o_ref[...] = jnp.broadcast_to(loss, o_ref.shape)


# ----------------------------------------------------------------------------
# pallas_call wrapper
# ----------------------------------------------------------------------------
def _const_spec(shape):
    nd = len(shape)
    return pl.BlockSpec(shape, lambda k: (0,) * nd)


def _pick_hw_tile(hw):
    for t in (2048, 1024, 512, 256, 128):
        if hw % t == 0 and hw // t >= 2:
            return t
    return hw


def _fused_forward(x1r, x2r, kp, n_per_view, hw_total, hw_tile):
    n_steps = hw_total // hw_tile
    nc = x1r.shape[1]

    weight_args = [
        kp["bb_w"], kp["bb_b"],
        kp["p1_w"], kp["p1_b"], kp["p1_g"], kp["p1_be"],
        kp["p2_w"], kp["p2_b"], kp["p2_g"], kp["p2_be"],
        kp["p3_w"], kp["p3_b"], kp["p3_g"], kp["p3_be"],
        kp["h1_w"], kp["h1_b"], kp["h1_g"], kp["h1_be"],
        kp["h2_w"], kp["h2_b"],
    ]

    x_spec = pl.BlockSpec((n_per_view, nc, hw_tile), lambda k: (0, 0, k))
    in_specs = [x_spec, x_spec] + [_const_spec(w.shape) for w in weight_args]

    kernel = functools.partial(_simsiam_fused_kernel,
                               n_per_view=n_per_view, hw_total=hw_total)

    out = pl.pallas_call(
        kernel,
        out_shape=jax.ShapeDtypeStruct((8, LANE_PAD), jnp.float32),
        grid_spec=pltpu.PrefetchScalarGridSpec(
            num_scalar_prefetch=0,
            grid=(n_steps,),
            in_specs=in_specs,
            out_specs=pl.BlockSpec((8, LANE_PAD), lambda k: (0, 0)),
            scratch_shapes=[pltpu.VMEM((2 * n_per_view, nc), jnp.float32)],
        ),
        compiler_params=pltpu.CompilerParams(
            dimension_semantics=("arbitrary",)),   # H*W axis is a reduction
    )(x1r, x2r, *weight_args)
    return out[0, 0]


@jax.jit
def _forward_impl(kparams, x1, x2):
    n, c, h, w = x1.shape
    hw = h * w
    # free views -- no HBM copies, no XLA concat of the two views
    x1r = x1.reshape(n, c, hw)
    x2r = x2.reshape(n, c, hw)
    # correctness holds for any N; layout-free reshapes/slices assume N % 8 == 0
    return _fused_forward(x1r, x2r, kparams, n, hw, _pick_hw_tile(hw))


def simsiam_forward(kparams, x1, x2, x3):
    # z3 = encoder(x3) / p3 = predictor(z3) are computed-then-unused in the
    # PyTorch forward; they do not affect L, so the dead x3 branch is dropped
    # (returned value is identical, ~1/3 less work).
    del x3
    return _forward_impl(kparams, x1, x2)


# ----------------------------------------------------------------------------
# Parameter construction (true PyTorch-like shapes) + kernel-side packing
# ----------------------------------------------------------------------------
def init_params(key, in_ch, feat_dim, proj_hidden, proj_out, pred_hidden):
    ks = jax.random.split(key, 6)

    def lin(k, d_in, d_out):
        kw, kb = jax.random.split(k)
        w = jax.random.normal(kw, (d_in, d_out), jnp.float32) * 0.1
        b = jax.random.normal(kb, (1, d_out), jnp.float32) * 0.01
        return w, b

    def bn(d):
        return jnp.ones((1, d), jnp.float32), jnp.zeros((1, d), jnp.float32)

    params = {}
    # backbone stand-in: GAP + fc  (fc.out_features == feat_dim)
    params["bb_fc"] = lin(ks[0], in_ch, feat_dim)
    # projection_MLP(in_dim=feat_dim, hidden_dim=proj_hidden, out_dim=proj_out)
    params["proj_l1"] = lin(ks[1], feat_dim, proj_hidden) + bn(proj_hidden)
    params["proj_l2"] = lin(ks[2], proj_hidden, proj_hidden) + bn(proj_hidden)
    # NOTE: layer3's BatchNorm1d has num_features=hidden_dim in the PyTorch
    # code, which requires proj_hidden == proj_out (true for defaults).
    params["proj_l3"] = lin(ks[3], proj_hidden, proj_out) + bn(proj_out)
    # prediction_MLP(in_dim=proj_out, hidden_dim=pred_hidden, out_dim=proj_out)
    params["pred_l1"] = lin(ks[4], proj_out, pred_hidden) + bn(pred_hidden)
    params["pred_l2"] = lin(ks[5], pred_hidden, proj_out)
    return params


def _pad_cols(a, cols):
    return jnp.pad(a, ((0, 0), (0, cols - a.shape[1])))


def _pad2(a, rows, cols):
    return jnp.pad(a, ((0, rows - a.shape[0]), (0, cols - a.shape[1])))


def prepare_kernel_params(params, pad=LANE_PAD):
    """Zero-pad all MLP feature dims to `pad` lanes; store MXU weights in bf16.

    The zero-padding invariant is exact: padded output lanes of every Linear
    stay 0 (zero weight columns / bias), BN with padded gamma=beta=0 keeps
    them 0 (var=0 -> xhat=0), ReLU keeps 0, and zero lanes contribute nothing
    to the cosine dots or norms.  Do NOT change the padding values.
    The backbone fc keeps its true (C, feat) row count (GAP is done in-kernel)
    and stays f32 (it is tiny and its K dim is the raw channel count)."""
    out = {}
    w, b = params["bb_fc"]
    out["bb_w"] = _pad_cols(w, pad)          # (C, feat_pad), f32
    out["bb_b"] = _pad_cols(b, pad)

    def pack(name, key, with_bn=True):
        if with_bn:
            ww, bb, gg, be = params[key]
        else:
            ww, bb = params[key]
        out[name + "_w"] = _pad2(ww, pad, pad).astype(jnp.bfloat16)  # bf16 MXU weight
        out[name + "_b"] = _pad_cols(bb, pad)                        # f32
        if with_bn:
            out[name + "_g"] = _pad_cols(gg, pad)
            out[name + "_be"] = _pad_cols(be, pad)

    pack("p1", "proj_l1")
    pack("p2", "proj_l2")
    pack("p3", "proj_l3")
    pack("h1", "pred_l1")
    pack("h2", "pred_l2", with_bn=False)
    return out


# ----------------------------------------------------------------------------
# Pure-JAX reference (f32) for a sanity check of the fused kernel
# ----------------------------------------------------------------------------
def _reference_forward(params, x1, x2, x3):
    hi = jax.lax.Precision.HIGHEST

    def bn_train(y, g, be):
        mu = jnp.mean(y, axis=0, keepdims=True)
        var = jnp.mean((y - mu) ** 2, axis=0, keepdims=True)
        return g * (y - mu) / jnp.sqrt(var + BN_EPS) + be

    def encoder(x):
        feats = jnp.mean(x, axis=(2, 3))
        w, b = params["bb_fc"]
        h = jnp.dot(feats, w, precision=hi) + b
        w, b, g, be = params["proj_l1"]
        h = jnp.maximum(bn_train(jnp.dot(h, w, precision=hi) + b, g, be), 0.0)
        w, b, g, be = params["proj_l2"]
        h = jnp.maximum(bn_train(jnp.dot(h, w, precision=hi) + b, g, be), 0.0)
        w, b, g, be = params["proj_l3"]
        return bn_train(jnp.dot(h, w, precision=hi) + b, g, be)

    def predictor(z):
        w, b, g, be = params["pred_l1"]
        h = jnp.maximum(bn_train(jnp.dot(z, w, precision=hi) + b, g, be), 0.0)
        w, b = params["pred_l2"]
        return jnp.dot(h, w, precision=hi) + b

    def D(p, z):
        dots = jnp.sum(p * z, axis=-1)
        pn = jnp.maximum(jnp.sqrt(jnp.sum(p * p, axis=-1)), COS_EPS)
        zn = jnp.maximum(jnp.sqrt(jnp.sum(z * z, axis=-1)), COS_EPS)
        return -jnp.mean(dots / (pn * zn))

    z1, z2 = encoder(x1), encoder(x2)
    p1, p2 = predictor(z1), predictor(z2)
    del x3  # dead in L (matches the PyTorch result)
    return D(p1, z2) / 2.0 + D(p2, z1) / 2.0


# ----------------------------------------------------------------------------
if __name__ == "__main__":
    # Small shapes consistent with the module's forward
    N, C, H, W = 8, 4, 16, 16
    FEAT = 32          # backbone.fc.out_features
    PROJ_HIDDEN = 32   # projection_MLP hidden_dim (== out_dim, required by layer3 BN)
    PROJ_OUT = 32
    PRED_HIDDEN = 16

    key = jax.random.PRNGKey(0)
    kp, k1, k2, k3 = jax.random.split(key, 4)

    params = init_params(kp, C, FEAT, PROJ_HIDDEN, PROJ_OUT, PRED_HIDDEN)
    kparams = prepare_kernel_params(params)

    x1 = jax.random.normal(k1, (N, C, H, W), jnp.float32)
    x2 = jax.random.normal(k2, (N, C, H, W), jnp.float32)
    x3 = jax.random.normal(k3, (N, C, H, W), jnp.float32)

    L = simsiam_forward(kparams, x1, x2, x3)
    L = jax.block_until_ready(L)
    assert L.shape == () and bool(jnp.isfinite(L))

    L_ref = float(_reference_forward(params, x1, x2, x3))
    assert abs(float(L) - L_ref) <= 5e-2 * max(1.0, abs(L_ref)), (float(L), L_ref)

    print("KERNEL_OK")
</pallas_src>

<mosaic_0001>
module attributes {stable_mosaic.version = 11 : i64} {
  func.func @_simsiam_fused_kernel(%arg0: i32, %arg1: memref<8x4x128xf32, #tpu.memory_space<vmem>>, %arg2: memref<8x4x128xf32, #tpu.memory_space<vmem>>, %arg3: memref<4x128xf32, #tpu.memory_space<vmem>>, %arg4: memref<1x128xf32, #tpu.memory_space<vmem>>, %arg5: memref<128x128xbf16, #tpu.memory_space<vmem>>, %arg6: memref<1x128xf32, #tpu.memory_space<vmem>>, %arg7: memref<1x128xf32, #tpu.memory_space<vmem>>, %arg8: memref<1x128xf32, #tpu.memory_space<vmem>>, %arg9: memref<128x128xbf16, #tpu.memory_space<vmem>>, %arg10: memref<1x128xf32, #tpu.memory_space<vmem>>, %arg11: memref<1x128xf32, #tpu.memory_space<vmem>>, %arg12: memref<1x128xf32, #tpu.memory_space<vmem>>, %arg13: memref<128x128xbf16, #tpu.memory_space<vmem>>, %arg14: memref<1x128xf32, #tpu.memory_space<vmem>>, %arg15: memref<1x128xf32, #tpu.memory_space<vmem>>, %arg16: memref<1x128xf32, #tpu.memory_space<vmem>>, %arg17: memref<128x128xbf16, #tpu.memory_space<vmem>>, %arg18: memref<1x128xf32, #tpu.memory_space<vmem>>, %arg19: memref<1x128xf32, #tpu.memory_space<vmem>>, %arg20: memref<1x128xf32, #tpu.memory_space<vmem>>, %arg21: memref<128x128xbf16, #tpu.memory_space<vmem>>, %arg22: memref<1x128xf32, #tpu.memory_space<vmem>>, %arg23: memref<8x128xf32, #tpu.memory_space<vmem>>, %arg24: memref<16x4xf32, #tpu.memory_space<vmem>>) attributes {dimension_semantics = [#tpu.dimension_semantics<arbitrary>], iteration_bounds = array<i64: 2>, scalar_prefetch = 0 : i64, scratch_operands = 1 : i64, tpu.core_type = #tpu.core_type<tc>, window_params = [{transform_indices = @transform_0, window_bounds = array<i64: 8, 4, 128>}, {transform_indices = @transform_1, window_bounds = array<i64: 8, 4, 128>}, {pipeline_mode = #tpu.pipeline_mode<synchronous>, transform_indices = @transform_2, window_bounds = array<i64: 4, 128>}, {pipeline_mode = #tpu.pipeline_mode<synchronous>, transform_indices = @transform_3, window_bounds = array<i64: 1, 128>}, {pipeline_mode = #tpu.pipeline_mode<synchronous>, transform_indices = @transform_4, window_bounds = array<i64: 128, 128>}, {pipeline_mode = #tpu.pipeline_mode<synchronous>, transform_indices = @transform_5, window_bounds = array<i64: 1, 128>}, {pipeline_mode = #tpu.pipeline_mode<synchronous>, transform_indices = @transform_6, window_bounds = array<i64: 1, 128>}, {pipeline_mode = #tpu.pipeline_mode<synchronous>, transform_indices = @transform_7, window_bounds = array<i64: 1, 128>}, {pipeline_mode = #tpu.pipeline_mode<synchronous>, transform_indices = @transform_8, window_bounds = array<i64: 128, 128>}, {pipeline_mode = #tpu.pipeline_mode<synchronous>, transform_indices = @transform_9, window_bounds = array<i64: 1, 128>}, {pipeline_mode = #tpu.pipeline_mode<synchronous>, transform_indices = @transform_10, window_bounds = array<i64: 1, 128>}, {pipeline_mode = #tpu.pipeline_mode<synchronous>, transform_indices = @transform_11, window_bounds = array<i64: 1, 128>}, {pipeline_mode = #tpu.pipeline_mode<synchronous>, transform_indices = @transform_12, window_bounds = array<i64: 128, 128>}, {pipeline_mode = #tpu.pipeline_mode<synchronous>, transform_indices = @transform_13, window_bounds = array<i64: 1, 128>}, {pipeline_mode = #tpu.pipeline_mode<synchronous>, transform_indices = @transform_14, window_bounds = array<i64: 1, 128>}, {pipeline_mode = #tpu.pipeline_mode<synchronous>, transform_indices = @transform_15, window_bounds = array<i64: 1, 128>}, {pipeline_mode = #tpu.pipeline_mode<synchronous>, transform_indices = @transform_16, window_bounds = array<i64: 128, 128>}, {pipeline_mode = #tpu.pipeline_mode<synchronous>, transform_indices = @transform_17, window_bounds = array<i64: 1, 128>}, {pipeline_mode = #tpu.pipeline_mode<synchronous>, transform_indices = @transform_18, window_bounds = array<i64: 1, 128>}, {pipeline_mode = #tpu.pipeline_mode<synchronous>, transform_indices = @transform_19, window_bounds = array<i64: 1, 128>}, {pipeline_mode = #tpu.pipeline_mode<synchronous>, transform_indices = @transform_20, window_bounds = array<i64: 128, 128>}, {pipeline_mode = #tpu.pipeline_mode<synchronous>, transform_indices = @transform_21, window_bounds = array<i64: 1, 128>}, {pipeline_mode = #tpu.pipeline_mode<synchronous>, transform_indices = @transform_22, window_bounds = array<i64: 8, 128>}]} {
    %c0_i32 = arith.constant 0 : i32
    %0 = arith.cmpi eq, %arg0, %c0_i32 : i32
    %1 = arith.extui %0 : i1 to i32
    %c0_i32_0 = arith.constant 0 : i32
    %2 = arith.cmpi ne, %1, %c0_i32_0 : i32
    scf.if %2 {
      %cst_15 = arith.constant 0.000000e+00 : f32
      %16 = vector.broadcast %cst_15 : f32 to vector<16x4xf32>
      %c0_16 = arith.constant 0 : index
      %c0_17 = arith.constant 0 : index
      %17 = vector.load %arg24[%c0_16, %c0_17] : memref<16x4xf32, #tpu.memory_space<vmem>>, vector<16x4xf32>
      tpu.vector_store %arg24[%c0_16, %c0_17], %16 {strides = array<i32>} : memref<16x4xf32, #tpu.memory_space<vmem>>, vector<16x4xf32>,
    } else {
    }
    %c0 = arith.constant 0 : index
    %c0_1 = arith.constant 0 : index
    %3 = vector.load %arg24[%c0, %c0_1] : memref<16x4xf32, #tpu.memory_space<vmem>>, vector<8x4xf32>
    %c0_2 = arith.constant 0 : index
    %c0_3 = arith.constant 0 : index
    %c0_4 = arith.constant 0 : index
    %4 = vector.load %arg1[%c0_2, %c0_3, %c0_4] : memref<8x4x128xf32, #tpu.memory_space<vmem>>, vector<8x4x128xf32>
    %cst = arith.constant dense<0.000000e+00> : vector<8x4xf32>
    %5 = vector.multi_reduction <add>, %4, %cst [2] : vector<8x4x128xf32> to vector<8x4xf32>
    %6 = arith.addf %3, %5 : vector<8x4xf32>
    %c0_5 = arith.constant 0 : index
    %c0_6 = arith.constant 0 : index
    %7 = vector.load %arg24[%c0_5, %c0_6] : memref<16x4xf32, #tpu.memory_space<vmem>>, vector<8x4xf32>
    tpu.vector_store %arg24[%c0_5, %c0_6], %6 {strides = array<i32>} : memref<16x4xf32, #tpu.memory_space<vmem>>, vector<8x4xf32>,
    %c8 = arith.constant 8 : index
    %c0_7 = arith.constant 0 : index
    %8 = vector.load %arg24[%c8, %c0_7] : memref<16x4xf32, #tpu.memory_space<vmem>>, vector<8x4xf32>
    %c0_8 = arith.constant 0 : index
    %c0_9 = arith.constant 0 : index
    %c0_10 = arith.constant 0 : index
    %9 = vector.load %arg2[%c0_8, %c0_9, %c0_10] : memref<8x4x128xf32, #tpu.memory_space<vmem>>, vector<8x4x128xf32>
    %cst_11 = arith.constant dense<0.000000e+00> : vector<8x4xf32>
    %10 = vector.multi_reduction <add>, %9, %cst_11 [2] : vector<8x4x128xf32> to vector<8x4xf32>
    %11 = arith.addf %8, %10 : vector<8x4xf32>
    %c8_12 = arith.constant 8 : index
    %c0_13 = arith.constant 0 : index
    %12 = vector.load %arg24[%c8_12, %c0_13] : memref<16x4xf32, #tpu.memory_space<vmem>>, vector<8x4xf32>
    tpu.vector_store %arg24[%c8_12, %c0_13], %11 {strides = array<i32>} : memref<16x4xf32, #tpu.memory_space<vmem>>, vector<8x4xf32>,
    %c1_i32 = arith.constant 1 : i32
    %13 = arith.cmpi eq, %arg0, %c1_i32 : i32
    %14 = arith.extui %13 : i1 to i32
    %c0_i32_14 = arith.constant 0 : i32
    %15 = arith.cmpi ne, %14, %c0_i32_14 : i32
    scf.if %15 {
      %c0_15 = arith.constant 0 : index
      %c0_16 = arith.constant 0 : index
      %16 = vector.load %arg24[%c0_15, %c0_16] : memref<16x4xf32, #tpu.memory_space<vmem>>, vector<16x4xf32>
      %cst_17 = arith.constant 3.906250e-03 : f32
      %17 = vector.broadcast %cst_17 : f32 to vector<16x4xf32>
      %18 = arith.mulf %16, %17 : vector<16x4xf32>
      %c0_18 = arith.constant 0 : index
      %c0_19 = arith.constant 0 : index
      %19 = vector.load %arg3[%c0_18, %c0_19] : memref<4x128xf32, #tpu.memory_space<vmem>>, vector<4x128xf32>
      %cst_20 = arith.constant dense<0.000000e+00> : vector<16x128xf32>
      %20 = tpu.matmul %18, %19, %cst_20 {dimension_numbers = #tpu.dot_dimension_numbers<[1], [0], [0], [1], [0, 0, 1, 1], [], []>} : vector<16x4xf32>, vector<4x128xf32>, vector<16x128xf32> -> vector<16x128xf32>
      %c0_21 = arith.constant 0 : index
      %c0_22 = arith.constant 0 : index
      %21 = vector.load %arg4[%c0_21, %c0_22] : memref<1x128xf32, #tpu.memory_space<vmem>>, vector<1x128xf32>
      %22 = vector.broadcast %21 : vector<1x128xf32> to vector<16x128xf32>
      %23 = arith.addf %20, %22 : vector<16x128xf32>
      %24 = arith.truncf %23 : vector<16x128xf32> to vector<16x128xbf16>
      %c0_23 = arith.constant 0 : index
      %c0_24 = arith.constant 0 : index
      %25 = vector.load %arg5[%c0_23, %c0_24] : memref<128x128xbf16, #tpu.memory_space<vmem>>, vector<128x128xbf16>
      %cst_25 = arith.constant dense<0.000000e+00> : vector<16x128xf32>
      %26 = tpu.matmul %24, %25, %cst_25 {dimension_numbers = #tpu.dot_dimension_numbers<[1], [0], [0], [1], [0, 0, 1, 1], [], []>} : vector<16x128xbf16>, vector<128x128xbf16>, vector<16x128xf32> -> vector<16x128xf32>
      %c0_26 = arith.constant 0 : index
      %c0_27 = arith.constant 0 : index
      %27 = vector.load %arg6[%c0_26, %c0_27] : memref<1x128xf32, #tpu.memory_space<vmem>>, vector<1x128xf32>
      %28 = vector.broadcast %27 : vector<1x128xf32> to vector<16x128xf32>
      %29 = arith.addf %26, %28 : vector<16x128xf32>
      %30 = vector.shape_cast %29 : vector<16x128xf32> to vector<2x8x128xf32>
      %cst_28 = arith.constant dense<0.000000e+00> : vector<2x128xf32>
      %31 = vector.multi_reduction <add>, %30, %cst_28 [1] : vector<2x8x128xf32> to vector<2x128xf32>
      %32 = vector.shape_cast %31 : vector<2x128xf32> to vector<2x1x128xf32>
      %cst_29 = arith.constant 8.000000e+00 : f32
      %33 = vector.broadcast %cst_29 : f32 to vector<2x1x128xf32>
      %34 = arith.divf %32, %33 : vector<2x1x128xf32>
      %35 = vector.broadcast %34 : vector<2x1x128xf32> to vector<2x8x128xf32>
      %36 = arith.subf %30, %35 : vector<2x8x128xf32>
      %37 = arith.mulf %36, %36 : vector<2x8x128xf32>
      %cst_30 = arith.constant dense<0.000000e+00> : vector<2x128xf32>
      %38 = vector.multi_reduction <add>, %37, %cst_30 [1] : vector<2x8x128xf32> to vector<2x128xf32>
      %39 = vector.shape_cast %38 : vector<2x128xf32> to vector<2x1x128xf32>
      %cst_31 = arith.constant 8.000000e+00 : f32
      %40 = vector.broadcast %cst_31 : f32 to vector<2x1x128xf32>
      %41 = arith.divf %39, %40 : vector<2x1x128xf32>
      %c0_32 = arith.constant 0 : index
      %c0_33 = arith.constant 0 : index
      %42 = vector.load %arg7[%c0_32, %c0_33] : memref<1x128xf32, #tpu.memory_space<vmem>>, vector<1x128xf32>
      %cst_34 = arith.constant 9.99999974E-6 : f32
      %43 = vector.broadcast %cst_34 : f32 to vector<2x1x128xf32>
      %44 = arith.addf %41, %43 : vector<2x1x128xf32>
      %45 = math.rsqrt %44 : vector<2x1x128xf32>
      %46 = vector.broadcast %45 : vector<2x1x128xf32> to vector<2x8x128xf32>
      %47 = arith.mulf %36, %46 : vector<2x8x128xf32>
      %48 = vector.shape_cast %42 : vector<1x128xf32> to vector<1x1x128xf32>
      %49 = vector.broadcast %48 : vector<1x1x128xf32> to vector<2x8x128xf32>
      %50 = arith.mulf %49, %47 : vector<2x8x128xf32>
      %c0_35 = arith.constant 0 : index
      %c0_36 = arith.constant 0 : index
      %51 = vector.load %arg8[%c0_35, %c0_36] : memref<1x128xf32, #tpu.memory_space<vmem>>, vector<1x128xf32>
      %52 = vector.shape_cast %51 : vector<1x128xf32> to vector<1x1x128xf32>
      %53 = vector.broadcast %52 : vector<1x1x128xf32> to vector<2x8x128xf32>
      %54 = arith.addf %50, %53 : vector<2x8x128xf32>
      %55 = vector.shape_cast %54 : vector<2x8x128xf32> to vector<16x128xf32>
      %cst_37 = arith.constant 0.000000e+00 : f32
      %56 = vector.broadcast %cst_37 : f32 to vector<16x128xf32>
      %57 = arith.maximumf %55, %56 : vector<16x128xf32>
      %58 = arith.truncf %57 : vector<16x128xf32> to vector<16x128xbf16>
      %c0_38 = arith.constant 0 : index
      %c0_39 = arith.constant 0 : index
      %59 = vector.load %arg9[%c0_38, %c0_39] : memref<128x128xbf16, #tpu.memory_space<vmem>>, vector<128x128xbf16>
      %cst_40 = arith.constant dense<0.000000e+00> : vector<16x128xf32>
      %60 = tpu.matmul %58, %59, %cst_40 {dimension_numbers = #tpu.dot_dimension_numbers<[1], [0], [0], [1], [0, 0, 1, 1], [], []>} : vector<16x128xbf16>, vector<128x128xbf16>, vector<16x128xf32> -> vector<16x128xf32>
      %c0_41 = arith.constant 0 : index
      %c0_42 = arith.constant 0 : index
      %61 = vector.load %arg10[%c0_41, %c0_42] : memref<1x128xf32, #tpu.memory_space<vmem>>, vector<1x128xf32>
      %62 = vector.broadcast %61 : vector<1x128xf32> to vector<16x128xf32>
      %63 = arith.addf %60, %62 : vector<16x128xf32>
      %64 = vector.shape_cast %63 : vector<16x128xf32> to vector<2x8x128xf32>
      %cst_43 = arith.constant dense<0.000000e+00> : vector<2x128xf32>
      %65 = vector.multi_reduction <add>, %64, %cst_43 [1] : vector<2x8x128xf32> to vector<2x128xf32>
      %66 = vector.shape_cast %65 : vector<2x128xf32> to vector<2x1x128xf32>
      %cst_44 = arith.constant 8.000000e+00 : f32
      %67 = vector.broadcast %cst_44 : f32 to vector<2x1x128xf32>
      %68 = arith.divf %66, %67 : vector<2x1x128xf32>
      %69 = vector.broadcast %68 : vector<2x1x128xf32> to vector<2x8x128xf32>
      %70 = arith.subf %64, %69 : vector<2x8x128xf32>
      %71 = arith.mulf %70, %70 : vector<2x8x128xf32>
      %cst_45 = arith.constant dense<0.000000e+00> : vector<2x128xf32>
      %72 = vector.multi_reduction <add>, %71, %cst_45 [1] : vector<2x8x128xf32> to vector<2x128xf32>
      %73 = vector.shape_cast %72 : vector<2x128xf32> to vector<2x1x128xf32>
      %cst_46 = arith.constant 8.000000e+00 : f32
      %74 = vector.broadcast %cst_46 : f32 to vector<2x1x128xf32>
      %75 = arith.divf %73, %74 : vector<2x1x128xf32>
      %c0_47 = arith.constant 0 : index
      %c0_48 = arith.constant 0 : index
      %76 = vector.load %arg11[%c0_47, %c0_48] : memref<1x128xf32, #tpu.memory_space<vmem>>, vector<1x128xf32>
      %cst_49 = arith.constant 9.99999974E-6 : f32
      %77 = vector.broadcast %cst_49 : f32 to vector<2x1x128xf32>
      %78 = arith.addf %75, %77 : vector<2x1x128xf32>
      %79 = math.rsqrt %78 : vector<2x1x128xf32>
      %80 = vector.broadcast %79 : vector<2x1x128xf32> to vector<2x8x128xf32>
      %81 = arith.mulf %70, %80 : vector<2x8x128xf32>
      %82 = vector.shape_cast %76 : vector<1x128xf32> to vector<1x1x128xf32>
      %83 = vector.broadcast %82 : vector<1x1x128xf32> to vector<2x8x128xf32>
      %84 = arith.mulf %83, %81 : vector<2x8x128xf32>
      %c0_50 = arith.constant 0 : index
      %c0_51 = arith.constant 0 : index
      %85 = vector.load %arg12[%c0_50, %c0_51] : memref<1x128xf32, #tpu.memory_space<vmem>>, vector<1x128xf32>
      %86 = vector.shape_cast %85 : vector<1x128xf32> to vector<1x1x128xf32>
      %87 = vector.broadcast %86 : vector<1x1x128xf32> to vector<2x8x128xf32>
      %88 = arith.addf %84, %87 : vector<2x8x128xf32>
      %89 = vector.shape_cast %88 : vector<2x8x128xf32> to vector<16x128xf32>
      %cst_52 = arith.constant 0.000000e+00 : f32
      %90 = vector.broadcast %cst_52 : f32 to vector<16x128xf32>
      %91 = arith.maximumf %89, %90 : vector<16x128xf32>
      %92 = arith.truncf %91 : vector<16x128xf32> to vector<16x128xbf16>
      %c0_53 = arith.constant 0 : index
      %c0_54 = arith.constant 0 : index
      %93 = vector.load %arg13[%c0_53, %c0_54] : memref<128x128xbf16, #tpu.memory_space<vmem>>, vector<128x128xbf16>
      %cst_55 = arith.constant dense<0.000000e+00> : vector<16x128xf32>
      %94 = tpu.matmul %92, %93, %cst_55 {dimension_numbers = #tpu.dot_dimension_numbers<[1], [0], [0], [1], [0, 0, 1, 1], [], []>} : vector<16x128xbf16>, vector<128x128xbf16>, vector<16x128xf32> -> vector<16x128xf32>
      %c0_56 = arith.constant 0 : index
      %c0_57 = arith.constant 0 : index
      %95 = vector.load %arg14[%c0_56, %c0_57] : memref<1x128xf32, #tpu.memory_space<vmem>>, vector<1x128xf32>
      %96 = vector.broadcast %95 : vector<1x128xf32> to vector<16x128xf32>
      %97 = arith.addf %94, %96 : vector<16x128xf32>
      %98 = vector.shape_cast %97 : vector<16x128xf32> to vector<2x8x128xf32>
      %cst_58 = arith.constant dense<0.000000e+00> : vector<2x128xf32>
      %99 = vector.multi_reduction <add>, %98, %cst_58 [1] : vector<2x8x128xf32> to vector<2x128xf32>
      %100 = vector.shape_cast %99 : vector<2x128xf32> to vector<2x1x128xf32>
      %cst_59 = arith.constant 8.000000e+00 : f32
      %101 = vector.broadcast %cst_59 : f32 to vector<2x1x128xf32>
      %102 = arith.divf %100, %101 : vector<2x1x128xf32>
      %103 = vector.broadcast %102 : vector<2x1x128xf32> to vector<2x8x128xf32>
      %104 = arith.subf %98, %103 : vector<2x8x128xf32>
      %105 = arith.mulf %104, %104 : vector<2x8x128xf32>
      %cst_60 = arith.constant dense<0.000000e+00> : vector<2x128xf32>
      %106 = vector.multi_reduction <add>, %105, %cst_60 [1] : vector<2x8x128xf32> to vector<2x128xf32>
      %107 = vector.shape_cast %106 : vector<2x128xf32> to vector<2x1x128xf32>
      %cst_61 = arith.constant 8.000000e+00 : f32
      %108 = vector.broadcast %cst_61 : f32 to vector<2x1x128xf32>
      %109 = arith.divf %107, %108 : vector<2x1x128xf32>
      %c0_62 = arith.constant 0 : index
      %c0_63 = arith.constant 0 : index
      %110 = vector.load %arg15[%c0_62, %c0_63] : memref<1x128xf32, #tpu.memory_space<vmem>>, vector<1x128xf32>
      %cst_64 = arith.constant 9.99999974E-6 : f32
      %111 = vector.broadcast %cst_64 : f32 to vector<2x1x128xf32>
      %112 = arith.addf %109, %111 : vector<2x1x128xf32>
      %113 = math.rsqrt %112 : vector<2x1x128xf32>
      %114 = vector.broadcast %113 : vector<2x1x128xf32> to vector<2x8x128xf32>
      %115 = arith.mulf %104, %114 : vector<2x8x128xf32>
      %116 = vector.shape_cast %110 : vector<1x128xf32> to vector<1x1x128xf32>
      %117 = vector.broadcast %116 : vector<1x1x128xf32> to vector<2x8x128xf32>
      %118 = arith.mulf %117, %115 : vector<2x8x128xf32>
      %c0_65 = arith.constant 0 : index
      %c0_66 = arith.constant 0 : index
      %119 = vector.load %arg16[%c0_65, %c0_66] : memref<1x128xf32, #tpu.memory_space<vmem>>, vector<1x128xf32>
      %120 = vector.shape_cast %119 : vector<1x128xf32> to vector<1x1x128xf32>
      %121 = vector.broadcast %120 : vector<1x1x128xf32> to vector<2x8x128xf32>
      %122 = arith.addf %118, %121 : vector<2x8x128xf32>
      %123 = vector.shape_cast %122 : vector<2x8x128xf32> to vector<16x128xf32>
      %124 = arith.truncf %123 : vector<16x128xf32> to vector<16x128xbf16>
      %c0_67 = arith.constant 0 : index
      %c0_68 = arith.constant 0 : index
      %125 = vector.load %arg17[%c0_67, %c0_68] : memref<128x128xbf16, #tpu.memory_space<vmem>>, vector<128x128xbf16>
      %cst_69 = arith.constant dense<0.000000e+00> : vector<16x128xf32>
      %126 = tpu.matmul %124, %125, %cst_69 {dimension_numbers = #tpu.dot_dimension_numbers<[1], [0], [0], [1], [0, 0, 1, 1], [], []>} : vector<16x128xbf16>, vector<128x128xbf16>, vector<16x128xf32> -> vector<16x128xf32>
      %c0_70 = arith.constant 0 : index
      %c0_71 = arith.constant 0 : index
      %127 = vector.load %arg18[%c0_70, %c0_71] : memref<1x128xf32, #tpu.memory_space<vmem>>, vector<1x128xf32>
      %128 = vector.broadcast %127 : vector<1x128xf32> to vector<16x128xf32>
      %129 = arith.addf %126, %128 : vector<16x128xf32>
      %130 = vector.shape_cast %129 : vector<16x128xf32> to vector<2x8x128xf32>
      %cst_72 = arith.constant dense<0.000000e+00> : vector<2x128xf32>
      %131 = vector.multi_reduction <add>, %130, %cst_72 [1] : vector<2x8x128xf32> to vector<2x128xf32>
      %132 = vector.shape_cast %131 : vector<2x128xf32> to vector<2x1x128xf32>
      %cst_73 = arith.constant 8.000000e+00 : f32
      %133 = vector.broadcast %cst_73 : f32 to vector<2x1x128xf32>
      %134 = arith.divf %132, %133 : vector<2x1x128xf32>
      %135 = vector.broadcast %134 : vector<2x1x128xf32> to vector<2x8x128xf32>
      %136 = arith.subf %130, %135 : vector<2x8x128xf32>
      %137 = arith.mulf %136, %136 : vector<2x8x128xf32>
      %cst_74 = arith.constant dense<0.000000e+00> : vector<2x128xf32>
      %138 = vector.multi_reduction <add>, %137, %cst_74 [1] : vector<2x8x128xf32> to vector<2x128xf32>
      %139 = vector.shape_cast %138 : vector<2x128xf32> to vector<2x1x128xf32>
      %cst_75 = arith.constant 8.000000e+00 : f32
      %140 = vector.broadcast %cst_75 : f32 to vector<2x1x128xf32>
      %141 = arith.divf %139, %140 : vector<2x1x128xf32>
      %c0_76 = arith.constant 0 : index
      %c0_77 = arith.constant 0 : index
      %142 = vector.load %arg19[%c0_76, %c0_77] : memref<1x128xf32, #tpu.memory_space<vmem>>, vector<1x128xf32>
      %cst_78 = arith.constant 9.99999974E-6 : f32
      %143 = vector.broadcast %cst_78 : f32 to vector<2x1x128xf32>
      %144 = arith.addf %141, %143 : vector<2x1x128xf32>
      %145 = math.rsqrt %144 : vector<2x1x128xf32>
      %146 = vector.broadcast %145 : vector<2x1x128xf32> to vector<2x8x128xf32>
      %147 = arith.mulf %136, %146 : vector<2x8x128xf32>
      %148 = vector.shape_cast %142 : vector<1x128xf32> to vector<1x1x128xf32>
      %149 = vector.broadcast %148 : vector<1x1x128xf32> to vector<2x8x128xf32>
      %150 = arith.mulf %149, %147 : vector<2x8x128xf32>
      %c0_79 = arith.constant 0 : index
      %c0_80 = arith.constant 0 : index
      %151 = vector.load %arg20[%c0_79, %c0_80] : memref<1x128xf32, #tpu.memory_space<vmem>>, vector<1x128xf32>
      %152 = vector.shape_cast %151 : vector<1x128xf32> to vector<1x1x128xf32>
      %153 = vector.broadcast %152 : vector<1x1x128xf32> to vector<2x8x128xf32>
      %154 = arith.addf %150, %153 : vector<2x8x128xf32>
      %155 = vector.shape_cast %154 : vector<2x8x128xf32> to vector<16x128xf32>
      %cst_81 = arith.constant 0.000000e+00 : f32
      %156 = vector.broadcast %cst_81 : f32 to vector<16x128xf32>
      %157 = arith.maximumf %155, %156 : vector<16x128xf32>
      %158 = arith.truncf %157 : vector<16x128xf32> to vector<16x128xbf16>
      %c0_82 = arith.constant 0 : index
      %c0_83 = arith.constant 0 : index
      %159 = vector.load %arg21[%c0_82, %c0_83] : memref<128x128xbf16, #tpu.memory_space<vmem>>, vector<128x128xbf16>
      %cst_84 = arith.constant dense<0.000000e+00> : vector<16x128xf32>
      %160 = tpu.matmul %158, %159, %cst_84 {dimension_numbers = #tpu.dot_dimension_numbers<[1], [0], [0], [1], [0, 0, 1, 1], [], []>} : vector<16x128xbf16>, vector<128x128xbf16>, vector<16x128xf32> -> vector<16x128xf32>
      %c0_85 = arith.constant 0 : index
      %c0_86 = arith.constant 0 : index
      %161 = vector.load %arg22[%c0_85, %c0_86] : memref<1x128xf32, #tpu.memory_space<vmem>>, vector<1x128xf32>
      %162 = vector.broadcast %161 : vector<1x128xf32> to vector<16x128xf32>
      %163 = arith.addf %160, %162 : vector<16x128xf32>
      %164 = vector.extract_strided_slice %123 {offsets = [0, 0], sizes = [8, 128], strides = [1, 1]} : vector<16x128xf32> to vector<8x128xf32>
      %165 = vector.extract_strided_slice %123 {offsets = [8, 0], sizes = [8, 128], strides = [1, 1]} : vector<16x128xf32> to vector<8x128xf32>
      %166 = vector.extract_strided_slice %163 {offsets = [0, 0], sizes = [8, 128], strides = [1, 1]} : vector<16x128xf32> to vector<8x128xf32>
      %167 = vector.extract_strided_slice %163 {offsets = [8, 0], sizes = [8, 128], strides = [1, 1]} : vector<16x128xf32> to vector<8x128xf32>
      %168 = arith.mulf %166, %165 : vector<8x128xf32>
      %cst_87 = arith.constant dense<0.000000e+00> : vector<8xf32>
      %169 = vector.multi_reduction <add>, %168, %cst_87 [1] : vector<8x128xf32> to vector<8xf32>
      %170 = vector.shape_cast %169 : vector<8xf32> to vector<8x1xf32>
      %171 = arith.mulf %166, %166 : vector<8x128xf32>
      %cst_88 = arith.constant dense<0.000000e+00> : vector<8xf32>
      %172 = vector.multi_reduction <add>, %171, %cst_88 [1] : vector<8x128xf32> to vector<8xf32>
      %173 = vector.shape_cast %172 : vector<8xf32> to vector<8x1xf32>
      %cst_89 = arith.constant 1.000000e-16 : f32
      %174 = vector.broadcast %cst_89 : f32 to vector<8x1xf32>
      %175 = arith.maximumf %173, %174 : vector<8x1xf32>
      %176 = math.rsqrt %175 : vector<8x1xf32>
      %177 = arith.mulf %165, %165 : vector<8x128xf32>
      %cst_90 = arith.constant dense<0.000000e+00> : vector<8xf32>
      %178 = vector.multi_reduction <add>, %177, %cst_90 [1] : vector<8x128xf32> to vector<8xf32>
      %179 = vector.shape_cast %178 : vector<8xf32> to vector<8x1xf32>
      %cst_91 = arith.constant 1.000000e-16 : f32
      %180 = vector.broadcast %cst_91 : f32 to vector<8x1xf32>
      %181 = arith.maximumf %179, %180 : vector<8x1xf32>
      %182 = math.rsqrt %181 : vector<8x1xf32>
      %183 = arith.mulf %170, %176 : vector<8x1xf32>
      %184 = arith.mulf %183, %182 : vector<8x1xf32>
      %cst_92 = arith.constant dense<0.000000e+00> : vector<1xf32>
      %185 = vector.multi_reduction <add>, %184, %cst_92 [0] : vector<8x1xf32> to vector<1xf32>
      %186 = vector.shape_cast %185 : vector<1xf32> to vector<1x1xf32>
      %187 = arith.mulf %167, %164 : vector<8x128xf32>
      %cst_93 = arith.constant dense<0.000000e+00> : vector<8xf32>
      %188 = vector.multi_reduction <add>, %187, %cst_93 [1] : vector<8x128xf32> to vector<8xf32>
      %189 = vector.shape_cast %188 : vector<8xf32> to vector<8x1xf32>
      %190 = arith.mulf %167, %167 : vector<8x128xf32>
      %cst_94 = arith.constant dense<0.000000e+00> : vector<8xf32>
      %191 = vector.multi_reduction <add>, %190, %cst_94 [1] : vector<8x128xf32> to vector<8xf32>
      %192 = vector.shape_cast %191 : vector<8xf32> to vector<8x1xf32>
      %cst_95 = arith.constant 1.000000e-16 : f32
      %193 = vector.broadcast %cst_95 : f32 to vector<8x1xf32>
      %194 = arith.maximumf %192, %193 : vector<8x1xf32>
      %195 = math.rsqrt %194 : vector<8x1xf32>
      %196 = arith.mulf %164, %164 : vector<8x128xf32>
      %cst_96 = arith.constant dense<0.000000e+00> : vector<8xf32>
      %197 = vector.multi_reduction <add>, %196, %cst_96 [1] : vector<8x128xf32> to vector<8xf32>
      %198 = vector.shape_cast %197 : vector<8xf32> to vector<8x1xf32>
      %cst_97 = arith.constant 1.000000e-16 : f32
      %199 = vector.broadcast %cst_97 : f32 to vector<8x1xf32>
      %200 = arith.maximumf %198, %199 : vector<8x1xf32>
      %201 = math.rsqrt %200 : vector<8x1xf32>
      %202 = arith.mulf %189, %195 : vector<8x1xf32>
      %203 = arith.mulf %202, %201 : vector<8x1xf32>
      %cst_98 = arith.constant dense<0.000000e+00> : vector<1xf32>
      %204 = vector.multi_reduction <add>, %203, %cst_98 [0] : vector<8x1xf32> to vector<1xf32>
      %205 = vector.shape_cast %204 : vector<1xf32> to vector<1x1xf32>
      %206 = arith.addf %186, %205 : vector<1x1xf32>
      %cst_99 = arith.constant 0.000000e+00 : f32
      %207 = vector.broadcast %cst_99 : f32 to vector<1x1xf32>
      %208 = arith.subf %207, %206 : vector<1x1xf32>
      %cst_100 = arith.constant 6.250000e-02 : f32
      %209 = vector.broadcast %cst_100 : f32 to vector<1x1xf32>
      %210 = arith.mulf %208, %209 : vector<1x1xf32>
      %211 = vector.shape_cast %210 : vector<1x1xf32> to vector<1x1xf32>
      %212 = vector.broadcast %211 : vector<1x1xf32> to vector<8x128xf32>
      %c0_101 = arith.constant 0 : index
      %c0_102 = arith.constant 0 : index
      %213 = vector.load %arg23[%c0_101, %c0_102] : memref<8x128xf32, #tpu.memory_space<vmem>>, vector<8x128xf32>
      tpu.vector_store %arg23[%c0_101, %c0_102], %212 {strides = array<i32>} : memref<8x128xf32, #tpu.memory_space<vmem>>, vector<8x128xf32>,
    } else {
    }
    return
  }
  func.func @transform_0(%arg0: i32) -> (i32, i32, i32) {
    %c0_i32 = arith.constant 0 : i32
    %c0_i32_0 = arith.constant 0 : i32
    %c0_i32_1 = arith.constant 0 : i32
    return %c0_i32, %c0_i32_0, %arg0 : i32, i32, i32
  }
  func.func @transform_1(%arg0: i32) -> (i32, i32, i32) {
    %c0_i32 = arith.constant 0 : i32
    %c0_i32_0 = arith.constant 0 : i32
    %c0_i32_1 = arith.constant 0 : i32
    return %c0_i32, %c0_i32_0, %arg0 : i32, i32, i32
  }
  func.func @transform_2(%arg0: i32) -> (i32, i32) {
    %c0_i32 = arith.constant 0 : i32
    %c0_i32_0 = arith.constant 0 : i32
    %c0_i32_1 = arith.constant 0 : i32
    return %c0_i32, %c0_i32_0 : i32, i32
  }
  func.func @transform_3(%arg0: i32) -> (i32, i32) {
    %c0_i32 = arith.constant 0 : i32
    %c0_i32_0 = arith.constant 0 : i32
    %c0_i32_1 = arith.constant 0 : i32
    return %c0_i32, %c0_i32_0 : i32, i32
  }
  func.func @transform_4(%arg0: i32) -> (i32, i32) {
    %c0_i32 = arith.constant 0 : i32
    %c0_i32_0 = arith.constant 0 : i32
    %c0_i32_1 = arith.constant 0 : i32
    return %c0_i32, %c0_i32_0 : i32, i32
  }
  func.func @transform_5(%arg0: i32) -> (i32, i32) {
    %c0_i32 = arith.constant 0 : i32
    %c0_i32_0 = arith.constant 0 : i32
    %c0_i32_1 = arith.constant 0 : i32
    return %c0_i32, %c0_i32_0 : i32, i32
  }
  func.func @transform_6(%arg0: i32) -> (i32, i32) {
    %c0_i32 = arith.constant 0 : i32
    %c0_i32_0 = arith.constant 0 : i32
    %c0_i32_1 = arith.constant 0 : i32
    return %c0_i32, %c0_i32_0 : i32, i32
  }
  func.func @transform_7(%arg0: i32) -> (i32, i32) {
    %c0_i32 = arith.constant 0 : i32
    %c0_i32_0 = arith.constant 0 : i32
    %c0_i32_1 = arith.constant 0 : i32
    return %c0_i32, %c0_i32_0 : i32, i32
  }
  func.func @transform_8(%arg0: i32) -> (i32, i32) {
    %c0_i32 = arith.constant 0 : i32
    %c0_i32_0 = arith.constant 0 : i32
    %c0_i32_1 = arith.constant 0 : i32
    return %c0_i32, %c0_i32_0 : i32, i32
  }
  func.func @transform_9(%arg0: i32) -> (i32, i32) {
    %c0_i32 = arith.constant 0 : i32
    %c0_i32_0 = arith.constant 0 : i32
    %c0_i32_1 = arith.constant 0 : i32
    return %c0_i32, %c0_i32_0 : i32, i32
  }
  func.func @transform_10(%arg0: i32) -> (i32, i32) {
    %c0_i32 = arith.constant 0 : i32
    %c0_i32_0 = arith.constant 0 : i32
    %c0_i32_1 = arith.constant 0 : i32
    return %c0_i32, %c0_i32_0 : i32, i32
  }
  func.func @transform_11(%arg0: i32) -> (i32, i32) {
    %c0_i32 = arith.constant 0 : i32
    %c0_i32_0 = arith.constant 0 : i32
    %c0_i32_1 = arith.constant 0 : i32
    return %c0_i32, %c0_i32_0 : i32, i32
  }
  func.func @transform_12(%arg0: i32) -> (i32, i32) {
    %c0_i32 = arith.constant 0 : i32
    %c0_i32_0 = arith.constant 0 : i32
    %c0_i32_1 = arith.constant 0 : i32
    return %c0_i32, %c0_i32_0 : i32, i32
  }
  func.func @transform_13(%arg0: i32) -> (i32, i32) {
    %c0_i32 = arith.constant 0 : i32
    %c0_i32_0 = arith.constant 0 : i32
    %c0_i32_1 = arith.constant 0 : i32
    return %c0_i32, %c0_i32_0 : i32, i32
  }
  func.func @transform_14(%arg0: i32) -> (i32, i32) {
    %c0_i32 = arith.constant 0 : i32
    %c0_i32_0 = arith.constant 0 : i32
    %c0_i32_1 = arith.constant 0 : i32
    return %c0_i32, %c0_i32_0 : i32, i32
  }
  func.func @transform_15(%arg0: i32) -> (i32, i32) {
    %c0_i32 = arith.constant 0 : i32
    %c0_i32_0 = arith.constant 0 : i32
    %c0_i32_1 = arith.constant 0 : i32
    return %c0_i32, %c0_i32_0 : i32, i32
  }
  func.func @transform_16(%arg0: i32) -> (i32, i32) {
    %c0_i32 = arith.constant 0 : i32
    %c0_i32_0 = arith.constant 0 : i32
    %c0_i32_1 = arith.constant 0 : i32
    return %c0_i32, %c0_i32_0 : i32, i32
  }
  func.func @transform_17(%arg0: i32) -> (i32, i32) {
    %c0_i32 = arith.constant 0 : i32
    %c0_i32_0 = arith.constant 0 : i32
    %c0_i32_1 = arith.constant 0 : i32
    return %c0_i32, %c0_i32_0 : i32, i32
  }
  func.func @transform_18(%arg0: i32) -> (i32, i32) {
    %c0_i32 = arith.constant 0 : i32
    %c0_i32_0 = arith.constant 0 : i32
    %c0_i32_1 = arith.constant 0 : i32
    return %c0_i32, %c0_i32_0 : i32, i32
  }
  func.func @transform_19(%arg0: i32) -> (i32, i32) {
    %c0_i32 = arith.constant 0 : i32
    %c0_i32_0 = arith.constant 0 : i32
    %c0_i32_1 = arith.constant 0 : i32
    return %c0_i32, %c0_i32_0 : i32, i32
  }
  func.func @transform_20(%arg0: i32) -> (i32, i32) {
    %c0_i32 = arith.constant 0 : i32
    %c0_i32_0 = arith.constant 0 : i32
    %c0_i32_1 = arith.constant 0 : i32
    return %c0_i32, %c0_i32_0 : i32, i32
  }
  func.func @transform_21(%arg0: i32) -> (i32, i32) {
    %c0_i32 = arith.constant 0 : i32
    %c0_i32_0 = arith.constant 0 : i32
    %c0_i32_1 = arith.constant 0 : i32
    return %c0_i32, %c0_i32_0 : i32, i32
  }
  func.func @transform_22(%arg0: i32) -> (i32, i32) {
    %c0_i32 = arith.constant 0 : i32
    %c0_i32_0 = arith.constant 0 : i32
    %c0_i32_1 = arith.constant 0 : i32
    return %c0_i32, %c0_i32_0 : i32, i32
  }
}

</mosaic_0001>

<bundles_post_ra>
// kernel: _forward_impl.1
= control target key start
LH: loop header
LB: loop body
LE: loop exit
PB: predicated region body
PF: predicated region fallthrough
CT: control target
= control target key end

     0   :  { %s2809_s0 = inlined_call_operand.vmem [shape: f32[8,4,256], index: 0, kind: input, shape index: {}]   ;;  %s2810_s1 = inlined_call_operand.vmem [shape: f32[8,4,256], index: 1, kind: input, shape index: {}]   ;;  %s2811_s2 = inlined_call_operand.vmem [shape: f32[4,128], index: 2, kind: input, shape index: {}]   ;;  %s2812_s3 = inlined_call_operand.vmem [shape: f32[1,128], index: 3, kind: input, shape index: {}]   ;;  %s2813_s4 = inlined_call_operand.vmem [shape: bf16[128,128], index: 4, kind: input, shape index: {}]   ;;  %s2814_s5 = inlined_call_operand.vmem [shape: f32[1,128], index: 5, kind: input, shape index: {}]   ;;  %s2815_s6 = inlined_call_operand.vmem [shape: f32[1,128], index: 6, kind: input, shape index: {}]   ;;  %s2816_s7 = inlined_call_operand.vmem [shape: f32[1,128], index: 7, kind: input, shape index: {}]   ;;  %s2817_s8 = inlined_call_operand.vmem [shape: bf16[128,128], index: 8, kind: input, shape index: {}]   ;;  %s2818_s9 = inlined_call_operand.vmem [shape: f32[1,128], index: 9, kind: input, shape index: {}]   ;;  %s2819_s10 = inlined_call_operand.vmem [shape: f32[1,128], index: 10, kind: input, shape index: {}]   ;;  %s2820_s11 = inlined_call_operand.vmem [shape: f32[1,128], index: 11, kind: input, shape index: {}]   ;;  %s2821_s12 = inlined_call_operand.vmem [shape: bf16[128,128], index: 12, kind: input, shape index: {}]   ;;  %s2822_s13 = inlined_call_operand.vmem [shape: f32[1,128], index: 13, kind: input, shape index: {}]   ;;  %s2823_s14 = inlined_call_operand.vmem [shape: f32[1,128], index: 14, kind: input, shape index: {}]   ;;  %s2824_s15 = inlined_call_operand.vmem [shape: f32[1,128], index: 15, kind: input, shape index: {}]   ;;  %s2825_s16 = inlined_call_operand.vmem [shape: bf16[128,128], index: 16, kind: input, shape index: {}]   ;;  %s2826_s17 = inlined_call_operand.vmem [shape: f32[1,128], index: 17, kind: input, shape index: {}]   ;;  %s2827_s18 = inlined_call_operand.vmem [shape: f32[1,128], index: 18, kind: input, shape index: {}]   ;;  %s2828_s19 = inlined_call_operand.vmem [shape: f32[1,128], index: 19, kind: input, shape index: {}]   ;;  %s2829_s20 = inlined_call_operand.vmem [shape: bf16[128,128], index: 20, kind: input, shape index: {}]   ;;  %s2830_s21 = inlined_call_operand.vmem [shape: f32[1,128], index: 21, kind: input, shape index: {}]   ;;  %s2831_s22 = inlined_call_operand.vmem [shape: f32[8,128], index: 22, kind: output, shape index: {}]  }
   0x1   :  { %2833 = sst [smem:[#allocation6_spill]] %s2809_s0 }
   0x2   :  { %2834 = sst [smem:[#allocation7_spill]] %s2810_s1 }
   0x3   :  { %2835 = sst [smem:[#allocation8_spill]] %s2811_s2 }
   0x4   :  { %2836 = sst [smem:[#allocation9_spill]] %s2812_s3 }
   0x5   :  { %2837 = sst [smem:[#allocation10_spill]] %s2813_s4 }
   0x6   :  { %2838 = sst [smem:[#allocation11_spill]] %s2814_s5 }
   0x7   :  { %2839 = sst [smem:[#allocation12_spill]] %s2815_s6 }
   0x8   :  { %s2463_s3 = smov 0   ;;  %s2465_s28 = smov 0  }
   0x9   :  { %s2467_s29 = smov 0  }
   0xa LB: > { %s2480_s4 = sadd.s32 1, %s2343_s29   ;;  %s39_s23 = sadd.s32 1, %s2339_s28  ;;  %s2343_s29 = sphi %s2467_s29, %s2855_s29   ;;  %s2339_s28 = sphi %s2465_s28, %s2854_s28   ;;  %s2335_s3 = sphi %s2463_s3, %s2853_s3  }
   0xb   : > { %s36_s0 = ssub.s32 %s2343_s29, %s2480_s4  ;;  %p46_p1 = scmp.ne.s32.totalorder %s2339_s28, %s2335_s3 }
   0xc   : > { %p37_p0 = scmp.eq.s32.totalorder %s36_s0, 0  ;;  %p47_p2 = scmp.eq.s32.totalorder %s2343_s29, 0 }
   0xd   : > { %p2008_p4 = scmp.ge.s32.totalorder %s2343_s29, 2 }
   0xe   : > { %s2489_s1 = scalar_select %p37_p0, %s2339_s28, %s39_s23  }
   0xf   : > { %p2491_p3 = por %p47_p2, %p46_p1  ;;  %599 = sbr.rel (%p2008_p4) target bundleno = 52 (0x34), region = 96 }
  0x10   : > { %2840 = sst [smem:[#allocation5_spill]] %s2489_s1 }
  0x16   : > { %602 = sbr.rel (!%p2491_p3) target bundleno = 37 (0x25), region = 100  ;;  %s604_s24 = sand.u32 (%p2491_p3), 1, %s2339_s28  }
  0x17   : > { %s2010_s6 = sshll.u32 (%p2491_p3), %s2343_s29, 2  ;;  %s2009_s25 = sshll.u32 (%p2491_p3), %s604_s24, 5 }
  0x18   : > { %s2842_s27 = sld [smem:[#allocation6_spill]] (%p2491_p3)  ;;  %s606_s23 = scalar_lea.vmem (%p2491_p3), [#allocation3], %s2009_s25 }
  0x1e   : > { %s608_s0 = scalar_lea.vmem %s2842_s27, %s2010_s6 }
  0x1f   : > { %v624_v0 = vld [vmem:[%s608_s0] sm:$0xf]  ;;  %v626_v1 = vld [vmem:[%s608_s0 + $0x8] sm:$0xf]  ;;  %v628_v2 = vld [vmem:[%s608_s0 + $0x10] sm:$0xf] }
  0x20   : > { %625 = vst [vmem:[%s606_s23] sm:$0xf] %v624_v0  ;;  %627 = vst [vmem:[%s606_s23 + $0x4] sm:$0xf] %v626_v1  ;;  %v630_v3 = vld [vmem:[%s608_s0 + $0x18] sm:$0xf] }
  0x21   : > { %v632_v4 = vld [vmem:[%s608_s0 + $0x20] sm:$0xf]  ;;  %629 = vst [vmem:[%s606_s23 + $0x8] sm:$0xf] %v628_v2  ;;  %631 = vst [vmem:[%s606_s23 + $0xc] sm:$0xf] %v630_v3 }
  0x22   : > { %633 = vst [vmem:[%s606_s23 + $0x10] sm:$0xf] %v632_v4  ;;  %v634_v5 = vld [vmem:[%s608_s0 + $0x28] sm:$0xf]  ;;  %v636_v6 = vld [vmem:[%s608_s0 + $0x30] sm:$0xf] }
  0x23   : > { %v638_v7 = vld [vmem:[%s608_s0 + $0x38] sm:$0xf]  ;;  %635 = vst [vmem:[%s606_s23 + $0x14] sm:$0xf] %v634_v5  ;;  %637 = vst [vmem:[%s606_s23 + $0x18] sm:$0xf] %v636_v6 }
  0x24   : > { %639 = vst [vmem:[%s606_s23 + $0x1c] sm:$0xf] %v638_v7 }
  0x25 PF: > { %678 = sbr.rel (!%p2491_p3) target bundleno = 52 (0x34), region = 141  ;;  %s680_s24 = sand.u32 (%p2491_p3), 1, %s2339_s28  }
  0x26   : > { %s2012_s6 = sshll.u32 (%p2491_p3), %s2343_s29, 2  ;;  %s2011_s25 = sshll.u32 (%p2491_p3), %s680_s24, 5 }
  0x27   : > { %s2843_s27 = sld [smem:[#allocation7_spill]] (%p2491_p3)  ;;  %s682_s1 = scalar_lea.vmem (%p2491_p3), [#allocation4], %s2011_s25 }
  0x2d   : > { %s684_s30 = scalar_lea.vmem %s2843_s27, %s2012_s6 }
  0x2e   : > { %v700_v8 = vld [vmem:[%s684_s30] sm:$0xf]  ;;  %v702_v9 = vld [vmem:[%s684_s30 + $0x8] sm:$0xf]  ;;  %v704_v10 = vld [vmem:[%s684_s30 + $0x10] sm:$0xf] }
  0x2f   : > { %701 = vst [vmem:[%s682_s1] sm:$0xf] %v700_v8  ;;  %703 = vst [vmem:[%s682_s1 + $0x4] sm:$0xf] %v702_v9  ;;  %v706_v11 = vld [vmem:[%s684_s30 + $0x18] sm:$0xf] }
  0x30   : > { %v708_v12 = vld [vmem:[%s684_s30 + $0x20] sm:$0xf]  ;;  %705 = vst [vmem:[%s682_s1 + $0x8] sm:$0xf] %v704_v10  ;;  %707 = vst [vmem:[%s682_s1 + $0xc] sm:$0xf] %v706_v11 }
  0x31   : > { %709 = vst [vmem:[%s682_s1 + $0x10] sm:$0xf] %v708_v12  ;;  %v710_v13 = vld [vmem:[%s684_s30 + $0x28] sm:$0xf]  ;;  %v712_v14 = vld [vmem:[%s684_s30 + $0x30] sm:$0xf] }
  0x32   : > { %v714_v15 = vld [vmem:[%s684_s30 + $0x38] sm:$0xf]  ;;  %711 = vst [vmem:[%s682_s1 + $0x14] sm:$0xf] %v710_v13  ;;  %713 = vst [vmem:[%s682_s1 + $0x18] sm:$0xf] %v712_v14 }
  0x33   : > { %715 = vst [vmem:[%s682_s1 + $0x1c] sm:$0xf] %v714_v15 }
  0x34 PF: > { %p2013_p5 = scmp.ge.s32.totalorder %s2343_s29, 1  ;;  %p753_p6 = scmp.lt.s32.totalorder %s2343_s29, 3 }
  0x36   : > { %p754_p7 = pnand %p2013_p5, %p753_p6 }
  0x37   : > { %s760_s5 = sand.u32 (!%p754_p7), 1, %s2335_s3   ;;  %s2844_s30 = sadd.s32 (!%p754_p7), 4294967295, %s2343_s29  }
  0x38   : > { %757 = sbr.rel (%p754_p7) target bundleno = 1956 (0x7a4), region = 182  ;;  %s2014_s0 = sshll.u32 (!%p754_p7), %s760_s5, 5 }
  0x39   : > { %s2513_s23 = scalar_lea.vmem (!%p754_p7), [#allocation3], %s2014_s0  ;;  %s2515_s24 = scalar_lea.vmem (!%p754_p7), [#allocation4], %s2014_s0 }
  0x3a   : > { %p2016_p8 = scmp.ne.s32.totalorder (!%p754_p7), %s2844_s30, 0 }
  0x3f   : > { %831 = sbr.rel (%p2016_p8) target bundleno = 70 (0x46), region = 194  ;;  %vm832_vm0 = vcmask (!%p2016_p8), 31744   ;;  %v2345_v16 = vmov (!%p2016_p8), 0.0  }
  0x40   : > { %833 = vst.msk [vmem:[#allocation2] sm:$0xff] (!%p2016_p8), %vm832_vm0, %v2345_v16  ;;  %834 = vst.msk [vmem:[#allocation2 + $0x8] sm:$0xff] (!%p2016_p8), %vm832_vm0, %v2345_v16 }
  0x46 PF: > { %vm844_vm1 = vcmask 1043456   ;;  %v930_v17 = vld [vmem:[%s2515_s24] sm:$0xf]  ;;  %v931_v21 = vld [vmem:[%s2515_s24 + $0x4] sm:$0xf]  ;;  %v877_v55 = vlaneseq  ;;  %vm911_vm2 = vcmask 1041409  }
  0x47   : > { %v836_v18 = vld [vmem:[%s2513_s23] sm:$0xf]  ;;  %v938_v19 = vsel %vm844_vm1, %v930_v17, 0.0  ;;  %v837_v22 = vld [vmem:[%s2513_s23 + $0x4] sm:$0xf]  ;;  %v941_v23 = vsel %vm844_vm1, %v931_v21, 0.0 }
  0x48   : > { %v845_v20 = vsel %vm844_vm1, %v836_v18, 0.0  ;;  %939 = vadd.xlane.f32.xlu1 %v938_v19  ;;  %v848_v24 = vsel %vm844_vm1, %v837_v22, 0.0  ;;  %v932_v25 = vld [vmem:[%s2515_s24 + $0x8] sm:$0xf]  ;;  %v933_v29 = vld [vmem:[%s2515_s24 + $0xc] sm:$0xf] }
  0x49   : > { %846 = vadd.xlane.f32.xlu0 %v845_v20  ;;  %v838_v26 = vld [vmem:[%s2513_s23 + $0x8] sm:$0xf]  ;;  %v944_v27 = vsel %vm844_vm1, %v932_v25, 0.0  ;;  %v839_v30 = vld [vmem:[%s2513_s23 + $0xc] sm:$0xf]  ;;  %v947_v31 = vsel %vm844_vm1, %v933_v29, 0.0 }
  0x4a   : > { %v851_v28 = vsel %vm844_vm1, %v838_v26, 0.0  ;;  %v854_v32 = vsel %vm844_vm1, %v839_v30, 0.0  ;;  %v934_v33 = vld [vmem:[%s2515_s24 + $0x10] sm:$0xf]  ;;  %v935_v37 = vld [vmem:[%s2515_s24 + $0x14] sm:$0xf] }
  0x4b   : > { %v840_v34 = vld [vmem:[%s2513_s23 + $0x10] sm:$0xf]  ;;  %v950_v35 = vsel %vm844_vm1, %v934_v33, 0.0  ;;  %v841_v38 = vld [vmem:[%s2513_s23 + $0x14] sm:$0xf]  ;;  %v953_v39 = vsel %vm844_vm1, %v935_v37, 0.0 }
  0x4c   : > { %942 = vadd.xlane.f32.xlu1 %v941_v23  ;;  %v857_v36 = vsel %vm844_vm1, %v840_v34, 0.0  ;;  %v860_v40 = vsel %vm844_vm1, %v841_v38, 0.0  ;;  %v936_v41 = vld [vmem:[%s2515_s24 + $0x18] sm:$0xf]  ;;  %v937_v45 = vld [vmem:[%s2515_s24 + $0x1c] sm:$0xf] }
  0x4d   : > { %849 = vadd.xlane.f32.xlu0 %v848_v24  ;;  %v842_v42 = vld [vmem:[%s2513_s23 + $0x18] sm:$0xf]  ;;  %v956_v43 = vsel %vm844_vm1, %v936_v41, 0.0  ;;  %v843_v46 = vld [vmem:[%s2513_s23 + $0x1c] sm:$0xf]  ;;  %v959_v47 = vsel %vm844_vm1, %v937_v45, 0.0 }
  0x4e   : > { %v863_v44 = vsel %vm844_vm1, %v842_v42, 0.0  ;;  %v866_v48 = vsel %vm844_vm1, %v843_v46, 0.0  ;;  %v878_v58 = vand.u32 127, %v877_v55  ;;  %v880_v59 = vshrl.u32 %v877_v55, 7  ;;  %v929_v29 = vld [vmem:[#allocation2 + $0x8] sm:$0xff]  ;;  %s2845_s3 = sadd.s32 4294967295, %s2343_s29  }
  0x4f   : > { %vm913_vm3 = vcmask 1042434   ;;  %vm915_vm4 = vcmask 1043459   ;;  %vm917_vm5 = vcmask 1044484   ;;  %vm919_vm6 = vcmask 1045509   ;;  %p2017_p9 = scmp.ne.s32.totalorder %s2845_s3, 1 }
  0x50   : > { %945 = vadd.xlane.f32.xlu1 %v944_v27  ;;  %v881_v62 = vsub.s32 %v878_v58, %v880_v59  ;;  %vm921_vm7 = vcmask 1046534   ;;  %vm923_vm8 = vcmask 1047559   ;;  %vm927_vm9 = vcmask 31744   ;;  %s2846_s25 = sld [smem:[#allocation8_spill]] (!%p2017_p9)  ;;  %s2847_s29 = sld [smem:[#allocation10_spill]] (!%p2017_p9)  ;;  %v2265_v59 = vld [vmem:[%s2817_s8] sm:$0xff] (!%p2017_p9)  }
  0x51   : > { %852 = vadd.xlane.f32.xlu0 %v851_v28  ;;  %vm2347_vm10 = vmmov (!%p2017_p9), 0   ;;  %s2849_s30 = sld [smem:[#allocation9_spill]] (!%p2017_p9)  ;;  %s2851_s23 = sld [smem:[#allocation12_spill]] (!%p2017_p9) }
  0x54   : > { %948 = vadd.xlane.f32.xlu1 %v947_v31  ;;  %v835_v31 = vld [vmem:[#allocation2] sm:$0xff] }
  0x55   : > { %855 = vadd.xlane.f32.xlu0 %v854_v32 }
  0x56   : > { %s2848_s27 = smov (!%p2017_p9), %s2847_s29  ;;  %v2257_v45 = vld [vmem:[%s2847_s29] sm:$0xff] (!%p2017_p9)   ;;  %s2850_s29 = sld [smem:[#allocation11_spill]] (!%p2017_p9) }
  0x57   : > { %v2258_v46 = vld [vmem:[%s2848_s27 + $0x8] sm:$0xff] (!%p2017_p9)  }
  0x58   : > { %951 = vadd.xlane.f32.xlu1 %v950_v35 }
  0x59   : > { %858 = vadd.xlane.f32.xlu0 %v857_v36 }
  0x5c   : > { %954 = vadd.xlane.f32.xlu1 %v953_v39  ;;  %v1020_v39 = vld [vmem:[%s2846_s25] sm:$0xf] (!%p2017_p9) }
  0x5d   : > { %861 = vadd.xlane.f32.xlu0 %v860_v40  ;;  %2125 = vmatprep.subr.msk.mxu0 (!%p2017_p9), %vm844_vm1, %v1020_v39 }
  0x5e   : > { %2126 = vmatpush3.msk.msra.mxu0 (!%p2017_p9), %vm844_vm1, %v1020_v39 }
  0x60   : > { %957 = vadd.xlane.f32.xlu1 %v956_v43 }
  0x61   : > { %864 = vadd.xlane.f32.xlu0 %v863_v44  ;;  %v2346_v44 = vmov (!%p2017_p9), 0.0  }
  0x62   : > { %2130 = vmatprep.subr.bf16.mxu1 (!%p2017_p9), %v2346_v44  ;;  %2150 = vmatprep.subr.bf16.mxu0 (!%p2017_p9), %v2346_v44 }
  0x63   : > { %2131 = vmatpush3.bf16.msra.mxu1 (!%p2017_p9), %v2257_v45  ;;  %2146 = vmatprep.mubr.msk.bf16.mxu1 (!%p2017_p9), %vm2347_vm10, %v2346_v44 }
  0x64   : > { %960 = vadd.xlane.f32.xlu1 %v959_v47  ;;  %2132 = vmatprep.subr.bf16.mxu1 (!%p2017_p9), %v2346_v44  ;;  %v2259_v47 = vld [vmem:[%s2848_s27 + $0x10] sm:$0xff] (!%p2017_p9)  }
  0x65   : > { %867 = vadd.xlane.f32.xlu0 %v866_v48  ;;  %v2260_v48 = vld [vmem:[%s2848_s27 + $0x18] sm:$0xff] (!%p2017_p9)  }
  0x67   : > { %2133 = vmatpush3.bf16.msra.mxu1 (!%p2017_p9), %v2258_v46  ;;  %v2031_v46 = vld [vmem:[%s2851_s23] ss:$0 sm:$0xff] (!%p2017_p9) }
  0x68   : > { %2134 = vmatprep.subr.bf16.mxu1 (!%p2017_p9), %v2346_v44 }
  0x6b   : > { %2135 = vmatpush3.bf16.msra.mxu1 (!%p2017_p9), %v2259_v47 }
  0x6c   : > { %2136 = vmatprep.subr.bf16.mxu1 (!%p2017_p9), %v2346_v44 }
  0x6f   : > { %2137 = vmatpush3.bf16.msra.mxu1 (!%p2017_p9), %v2260_v48 }
  0x70   : > { %2138 = vmatprep.subr.bf16.mxu1 (!%p2017_p9), %v2346_v44 }
  0xd5   : > { %v940_v49 = vpop.xlane.xlu1 %939 }
  0xd6   : > { %v847_v50 = vpop.xlane.xlu0 %846  ;;  %v973_v5 = vrot.slane %v940_v49, %v881_v62  ;;  %v2261_v49 = vld [vmem:[%s2848_s27 + $0x20] sm:$0xff] (!%p2017_p9)  }
  0xd7   : > { %v882_v6 = vrot.slane %v847_v50, %v881_v62  ;;  %v2262_v50 = vld [vmem:[%s2848_s27 + $0x28] sm:$0xff] (!%p2017_p9)   ;;  %2139 = vmatpush3.bf16.msra.mxu1 (!%p2017_p9), %v2261_v49  ;;  %v2032_v49 = vld [vmem:[%s2816_s7] ss:$0 sm:$0xff] (!%p2017_p9) }
  0xd8   : > { %2140 = vmatprep.subr.bf16.mxu1 (!%p2017_p9), %v2346_v44 }
  0xd9   : > { %v943_v51 = vpop.xlane.xlu1 %942 }
  0xda   : > { %v850_v52 = vpop.xlane.xlu0 %849  ;;  %v977_v1 = vrot.slane %v943_v51, %v881_v62  ;;  %v2263_v51 = vld [vmem:[%s2848_s27 + $0x30] sm:$0xff] (!%p2017_p9)  }
  0xdb   : > { %v886_v2 = vrot.slane %v850_v52, %v881_v62  ;;  %2141 = vmatpush3.bf16.msra.mxu1 (!%p2017_p9), %v2262_v50  ;;  %v2264_v52 = vld [vmem:[%s2848_s27 + $0x38] sm:$0xff] (!%p2017_p9)  }
  0xdc   : > { %v1002_v13 = vsel %vm911_vm2, %v977_v1, %v973_v5  ;;  %2142 = vmatprep.subr.bf16.mxu1 (!%p2017_p9), %v2346_v44  ;;  %v2271_v1 = vld [vmem:[%s2817_s8 + $0x30] sm:$0xff] (!%p2017_p9)  }
  0xdd   : > { %v946_v53 = vpop.xlane.xlu1 %945  ;;  %v912_v14 = vsel %vm911_vm2, %v886_v2, %v882_v6  ;;  %v2272_v2 = vld [vmem:[%s2817_s8 + $0x38] sm:$0xff] (!%p2017_p9)  }
  0xde   : > { %v853_v54 = vpop.xlane.xlu0 %852  ;;  %v981_v3 = vrot.slane %v946_v53, %v881_v62  ;;  %v2018_v53 = vld [vmem:[%s2849_s30] ss:$0 sm:$0xff] (!%p2017_p9) }
  0xdf   : > { %v890_v4 = vrot.slane %v853_v54, %v881_v62  ;;  %2143 = vmatpush3.bf16.msra.mxu1 (!%p2017_p9), %v2263_v51 }
  0xe0   : > { %v1003_v17 = vsel %vm913_vm3, %v981_v3, %v1002_v13  ;;  %2144 = vmatprep.subr.bf16.mxu1 (!%p2017_p9), %v2346_v44  ;;  %v2022_v3 = vld [vmem:[%s2850_s29] ss:$0 sm:$0xff] (!%p2017_p9) }
  0xe1   : > { %v949_v56 = vpop.xlane.xlu1 %948  ;;  %v914_v18 = vsel %vm913_vm3, %v890_v4, %v912_v14 }
  0xe2   : > { %v856_v57 = vpop.xlane.xlu0 %855  ;;  %v985_v7 = vrot.slane %v949_v56, %v881_v62 }
  0xe3   : > { %v894_v8 = vrot.slane %v856_v57, %v881_v62  ;;  %2145 = vmatpush3.bf16.msra.mxu1 (!%p2017_p9), %v2264_v52 }
  0xe4   : > { %v1004_v21 = vsel %vm915_vm4, %v985_v7, %v1003_v17  ;;  %2170 = vmatprep.subr.bf16.mxu1 (!%p2017_p9), %v2346_v44 }
  0xe5   : > { %v952_v60 = vpop.xlane.xlu1 %951  ;;  %v916_v22 = vsel %vm915_vm4, %v894_v8, %v914_v18 }
  0xe6   : > { %v859_v61 = vpop.xlane.xlu0 %858  ;;  %v989_v9 = vrot.slane %v952_v60, %v881_v62  ;;  %v2266_v60 = vld [vmem:[%s2817_s8 + $0x8] sm:$0xff] (!%p2017_p9)  }
  0xe7   : > { %v898_v10 = vrot.slane %v859_v61, %v881_v62  ;;  %v2267_v61 = vld [vmem:[%s2817_s8 + $0x10] sm:$0xff] (!%p2017_p9)  }
  0xe8   : > { %v1005_v23 = vsel %vm917_vm5, %v989_v9, %v1004_v21 }
  0xe9   : > { %v955_v63 = vpop.xlane.xlu1 %954  ;;  %v918_v24 = vsel %vm917_vm5, %v898_v10, %v916_v22 }
  0xea   : > { %v862_v0 = vpop.xlane.xlu0 %861  ;;  %v993_v15 = vrot.slane %v955_v63, %v881_v62  ;;  %v2269_v63 = vld [vmem:[%s2817_s8 + $0x20] sm:$0xff] (!%p2017_p9)  }
  0xeb   : > { %v902_v16 = vrot.slane %v862_v0, %v881_v62  ;;  %v2270_v0 = vld [vmem:[%s2817_s8 + $0x28] sm:$0xff] (!%p2017_p9)  }
  0xec   : > { %v1006_v27 = vsel %vm919_vm6, %v993_v15, %v1005_v23 }
  0xed   : > { %v958_v11 = vpop.xlane.xlu1 %957  ;;  %v920_v28 = vsel %vm919_vm6, %v902_v16, %v918_v24 }
  0xee   : > { %v865_v12 = vpop.xlane.xlu0 %864  ;;  %v997_v19 = vrot.slane %v958_v11, %v881_v62 }
  0xef   : > { %v906_v20 = vrot.slane %v865_v12, %v881_v62 }
  0xf0   : > { %v1007_v33 = vsel %vm921_vm7, %v997_v19, %v1006_v27 }
  0xf1   : > { %v961_v25 = vpop.xlane.xlu1 %960  ;;  %v922_v34 = vsel %vm921_vm7, %v906_v20, %v920_v28 }
  0xf2   : > { %v868_v26 = vpop.xlane.xlu0 %867  ;;  %v1001_v30 = vrot.slane %v961_v25, %v881_v62  ;;  %1015 = sbr.rel (%p2017_p9) target bundleno = 1956 (0x7a4), region = 198 }
  0xf3   : > { %v910_v32 = vrot.slane %v868_v26, %v881_v62  ;;  %v2268_v62 = vld [vmem:[%s2817_s8 + $0x18] sm:$0xff] (!%p2017_p9)  }
  0xf4   : > { %v1008_v35 = vsel %vm923_vm8, %v1001_v30, %v1007_v33 }
  0xf5   : > { %v924_v36 = vsel %vm923_vm8, %v910_v32, %v922_v34  ;;  %v1010_v37 = vadd.f32 %v1008_v35, %v929_v29 }
  0xf6   : > { %v926_v38 = vadd.f32 %v924_v36, %v835_v31 }
  0xf7   : > { %1011 = vst.msk [vmem:[#allocation2 + $0x8] sm:$0xff] %vm927_vm9, %v1010_v37 }
  0xf8   : > { %928 = vst.msk [vmem:[#allocation2] sm:$0xff] %vm927_vm9, %v926_v38 }
  0xfe   : > { %v1017_v41 = vld [vmem:[#allocation2 + $0x8] sm:$0xff] }
  0xff   : > { %v1016_v40 = vld [vmem:[#allocation2] sm:$0xff]  ;;  %v1019_v43 = vmul.f32 0.00390625, %v1017_v41 }
 0x100   : > { %v1018_v42 = vmul.f32 0.00390625, %v1016_v40 }
 0x102   : > { %2127 = vmatprep.mubr.msk.f32.mxu0 %vm927_vm9, %v1018_v42 }
 0x103   : > { %2128 = vmatmul.mubr.msk.f32.vlgmr.msra.gmra.mrb[0].mxu0 %vm927_vm9, %v1019_v43 }
 0x104   : > { %2166 = vmatprep.mubr.msk.bf16.mxu0 %vm2347_vm10, %v2346_v44  ;;  %2151 = vmatpush3.bf16.msra.mxu0 %v2265_v59  ;;  %v2274_v59 = vld [vmem:[%s2821_s12 + $0x8] sm:$0xff]  }
 0x105   : > { %2152 = vmatprep.subr.bf16.mxu0 %v2346_v44 }
 0x108   : > { %2153 = vmatpush3.bf16.msra.mxu0 %v2266_v60  ;;  %v2275_v60 = vld [vmem:[%s2821_s12 + $0x10] sm:$0xff]  }
 0x109   : > { %2154 = vmatprep.subr.bf16.mxu0 %v2346_v44 }
 0x10c   : > { %2155 = vmatpush3.bf16.msra.mxu0 %v2267_v61  ;;  %v2276_v61 = vld [vmem:[%s2821_s12 + $0x18] sm:$0xff]  }
 0x10d   : > { %2156 = vmatprep.subr.bf16.mxu0 %v2346_v44 }
 0x110   : > { %2157 = vmatpush3.bf16.msra.mxu0 %v2268_v62  ;;  %v2277_v62 = vld [vmem:[%s2821_s12 + $0x20] sm:$0xff]  }
 0x111   : > { %2158 = vmatprep.subr.bf16.mxu0 %v2346_v44 }
 0x114   : > { %2159 = vmatpush3.bf16.msra.mxu0 %v2269_v63  ;;  %v2278_v63 = vld [vmem:[%s2821_s12 + $0x28] sm:$0xff]  }
 0x115   : > { %2160 = vmatprep.subr.bf16.mxu0 %v2346_v44 }
 0x118   : > { %2161 = vmatpush3.bf16.msra.mxu0 %v2270_v0  ;;  %v2279_v0 = vld [vmem:[%s2821_s12 + $0x30] sm:$0xff]  }
 0x119   : > { %2162 = vmatprep.subr.bf16.mxu0 %v2346_v44 }
 0x11c   : > { %2163 = vmatpush3.bf16.msra.mxu0 %v2271_v1  ;;  %v2280_v1 = vld [vmem:[%s2821_s12 + $0x38] sm:$0xff]  }
 0x11d   : > { %2164 = vmatprep.subr.bf16.mxu0 %v2346_v44 }
 0x120   : > { %2165 = vmatpush3.bf16.msra.mxu0 %v2272_v2  ;;  %v2033_v2 = vld [vmem:[%s2818_s9] ss:$0 sm:$0xff] }
 0x121   : > { %2190 = vmatprep.subr.bf16.mxu0 %v2346_v44 }
 0x1d6   : > { %v2129_v54 = vpop.f32.mrb[0].mxu0 }
 0x1d7   : > { %v1109_v55 = vadd.f32 %v2129_v54, %v2018_v53  ;;  %v1103_v56 = vpop.f32.mrb[1].mxu0 }
 0x1d8   : > { %v1104_v57 = vadd.f32 %v2018_v53, %v1103_v56 }
 0x1da   : > { %v1112_v58 = vpack.c.bf16 %v1109_v55, %v1104_v57 }
 0x1dc   : > { %2147 = vmatmul.mubr.bf16.vlgmr.msra.gmra.mrb[0].mxu1 %v1112_v58  ;;  %v2273_v58 = vld [vmem:[%s2821_s12] sm:$0xff]  }
 0x1dd   : > { %2186 = vmatprep.mubr.msk.bf16.mxu1 %vm2347_vm10, %v2346_v44  ;;  %2171 = vmatpush3.bf16.msra.mxu1 %v2273_v58  ;;  %v2282_v58 = vld [vmem:[%s2825_s16 + $0x8] sm:$0xff]  }
 0x1de   : > { %2172 = vmatprep.subr.bf16.mxu1 %v2346_v44 }
 0x1e1   : > { %2173 = vmatpush3.bf16.msra.mxu1 %v2274_v59  ;;  %v2283_v59 = vld [vmem:[%s2825_s16 + $0x10] sm:$0xff]  }
 0x1e2   : > { %2174 = vmatprep.subr.bf16.mxu1 %v2346_v44 }
 0x1e5   : > { %2175 = vmatpush3.bf16.msra.mxu1 %v2275_v60  ;;  %v2284_v60 = vld [vmem:[%s2825_s16 + $0x18] sm:$0xff]  }
 0x1e6   : > { %2176 = vmatprep.subr.bf16.mxu1 %v2346_v44 }
 0x1e9   : > { %2177 = vmatpush3.bf16.msra.mxu1 %v2276_v61  ;;  %v2285_v61 = vld [vmem:[%s2825_s16 + $0x20] sm:$0xff]  }
 0x1ea   : > { %2178 = vmatprep.subr.bf16.mxu1 %v2346_v44 }
 0x1ed   : > { %2179 = vmatpush3.bf16.msra.mxu1 %v2277_v62  ;;  %v2286_v62 = vld [vmem:[%s2825_s16 + $0x28] sm:$0xff]  }
 0x1ee   : > { %2180 = vmatprep.subr.bf16.mxu1 %v2346_v44 }
 0x1f1   : > { %2181 = vmatpush3.bf16.msra.mxu1 %v2278_v63  ;;  %v2287_v63 = vld [vmem:[%s2825_s16 + $0x30] sm:$0xff]  }
 0x1f2   : > { %2182 = vmatprep.subr.bf16.mxu1 %v2346_v44 }
 0x1f5   : > { %2183 = vmatpush3.bf16.msra.mxu1 %v2279_v0  ;;  %v2288_v0 = vld [vmem:[%s2825_s16 + $0x38] sm:$0xff]  }
 0x1f6   : > { %2184 = vmatprep.subr.bf16.mxu1 %v2346_v44 }
 0x1f9   : > { %2185 = vmatpush3.bf16.msra.mxu1 %v2280_v1  ;;  %v2044_v1 = vld [vmem:[%s2822_s13] ss:$0 sm:$0xff] }
 0x1fa   : > { %2210 = vmatprep.subr.bf16.mxu1 %v2346_v44 }
 0x2af   : > { %v1218_v4 = vpop.f32.mrb[0].mxu1 }
 0x2b0   : > { %v1219_v5 = vadd.f32 %v2022_v3, %v1218_v4  ;;  %v2148_v6 = vpop.f32.mrb[1].mxu1 }
 0x2b1   : > { %v1221_v7 = vpop.f32.mrb[2].mxu1 }
 0x2b2   : > { %v1225_v8 = vrot.slane %v1219_v5, 4  ;;  %v1222_v9 = vadd.f32 %v2022_v3, %v1221_v7  ;;  %v2149_v10 = vpop.f32.mrb[3].mxu1 }
 0x2b4   : > { %v1226_v11 = vadd.f32 %v1225_v8, %v1219_v5  ;;  %v1231_v12 = vrot.slane %v1222_v9, 4 }
 0x2b6   : > { %v1227_v13 = vrot.slane %v1226_v11, 2  ;;  %v1232_v14 = vadd.f32 %v1231_v12, %v1222_v9 }
 0x2b8   : > { %v1228_v15 = vadd.f32 %v1227_v13, %v1226_v11  ;;  %v1233_v16 = vrot.slane %v1232_v14, 2 }
 0x2ba   : > { %v1229_v17 = vrot.slane %v1228_v15, 1  ;;  %v1234_v18 = vadd.f32 %v1233_v16, %v1232_v14 }
 0x2bc   : > { %v1230_v19 = vadd.f32 %v1229_v17, %v1228_v15  ;;  %v1235_v20 = vrot.slane %v1234_v18, 1 }
 0x2be   : > { %v1238_v21 = vmul.f32 0.125, %v1230_v19  ;;  %v1236_v22 = vadd.f32 %v1235_v20, %v1234_v18 }
 0x2c0   : > { %v1240_v23 = vsub.f32 %v1219_v5, %v1238_v21  ;;  %v1239_v24 = vmul.f32 0.125, %v1236_v22 }
 0x2c2   : > { %v1242_v25 = vmul.f32 %v1240_v23, %v1240_v23  ;;  %v1241_v26 = vsub.f32 %v1222_v9, %v1239_v24 }
 0x2c4   : > { %v1244_v27 = vrot.slane %v1242_v25, 4  ;;  %v1243_v28 = vmul.f32 %v1241_v26, %v1241_v26 }
 0x2c6   : > { %v1245_v29 = vadd.f32 %v1244_v27, %v1242_v25  ;;  %v1250_v30 = vrot.slane %v1243_v28, 4 }
 0x2c8   : > { %v1246_v31 = vrot.slane %v1245_v29, 2  ;;  %v1251_v32 = vadd.f32 %v1250_v30, %v1243_v28 }
 0x2ca   : > { %v1247_v33 = vadd.f32 %v1246_v31, %v1245_v29  ;;  %v1252_v34 = vrot.slane %v1251_v32, 2 }
 0x2cc   : > { %v1248_v35 = vrot.slane %v1247_v33, 1  ;;  %v1253_v36 = vadd.f32 %v1252_v34, %v1251_v32 }
 0x2ce   : > { %v1249_v37 = vadd.f32 %v1248_v35, %v1247_v33  ;;  %v1254_v38 = vrot.slane %v1253_v36, 1 }
 0x2d0   : > { %v1256_v39 = vmul.f32 0.125, %v1249_v37  ;;  %v1255_v40 = vadd.f32 %v1254_v38, %v1253_v36 }
 0x2d2   : > { %v1259_v41 = vadd.f32 1e-05, %v1256_v39  ;;  %v1257_v42 = vmul.f32 0.125, %v1255_v40 }
 0x2d4   : > { %2297 = vrsqrt.f32 %v1259_v41  ;;  %v1260_v43 = vadd.f32 1e-05, %v1257_v42 }
 0x2d6   : > { %2299 = vrsqrt.f32 %v1260_v43 }
 0x2de   : > { %v2298_v45 = vpop.eup %2297 }
 0x2df   : > { %v1263_v47 = vmul.f32 %v2298_v45, %v1240_v23  ;;  %v2042_v45 = vld [vmem:[%s2819_s10] ss:$0 sm:$0xff] }
 0x2e0   : > { %v2300_v48 = vpop.eup %2299 }
 0x2e1   : > { %v1271_v50 = vmul.f32 %v2031_v46, %v1263_v47  ;;  %v1264_v51 = vmul.f32 %v2300_v48, %v1241_v26  ;;  %v2043_v48 = vld [vmem:[%s2820_s11] ss:$0 sm:$0xff] }
 0x2e3   : > { %v1272_v52 = vmul.f32 %v2031_v46, %v1264_v51  ;;  %v1280_v53 = vadd.f32 %v2032_v49, %v1271_v50 }
 0x2e5   : > { %v1281_v54 = vadd.f32 %v2032_v49, %v1272_v52  ;;  %v1282_v55 = vmax.f32 %v1280_v53, 0.0 }
 0x2e7   : > { %v1283_v56 = vmax.f32 %v1281_v54, 0.0 }
 0x2e9   : > { %v1284_v57 = vpack.c.bf16 %v1283_v56, %v1282_v55 }
 0x2eb   : > { %2167 = vmatmul.mubr.bf16.vlgmr.msra.gmra.mrb[4].mxu0 %v1284_v57  ;;  %v2281_v57 = vld [vmem:[%s2825_s16] sm:$0xff]  }
 0x2ec   : > { %2206 = vmatprep.mubr.msk.bf16.mxu0 %vm2347_vm10, %v2346_v44  ;;  %2191 = vmatpush3.bf16.msra.mxu0 %v2281_v57  ;;  %v2290_v57 = vld [vmem:[%s2829_s20 + $0x8] sm:$0xff]  }
 0x2ed   : > { %2192 = vmatprep.subr.bf16.mxu0 %v2346_v44 }
 0x2f0   : > { %2193 = vmatpush3.bf16.msra.mxu0 %v2282_v58  ;;  %v2291_v58 = vld [vmem:[%s2829_s20 + $0x10] sm:$0xff]  }
 0x2f1   : > { %2194 = vmatprep.subr.bf16.mxu0 %v2346_v44 }
 0x2f4   : > { %2195 = vmatpush3.bf16.msra.mxu0 %v2283_v59  ;;  %v2292_v59 = vld [vmem:[%s2829_s20 + $0x18] sm:$0xff]  }
 0x2f5   : > { %2196 = vmatprep.subr.bf16.mxu0 %v2346_v44 }
 0x2f8   : > { %2197 = vmatpush3.bf16.msra.mxu0 %v2284_v60  ;;  %v2293_v60 = vld [vmem:[%s2829_s20 + $0x20] sm:$0xff]  }
 0x2f9   : > { %2198 = vmatprep.subr.bf16.mxu0 %v2346_v44 }
 0x2fc   : > { %2199 = vmatpush3.bf16.msra.mxu0 %v2285_v61  ;;  %v2294_v61 = vld [vmem:[%s2829_s20 + $0x28] sm:$0xff]  }
 0x2fd   : > { %2200 = vmatprep.subr.bf16.mxu0 %v2346_v44 }
 0x300   : > { %2201 = vmatpush3.bf16.msra.mxu0 %v2286_v62  ;;  %v2295_v62 = vld [vmem:[%s2829_s20 + $0x30] sm:$0xff]  }
 0x301   : > { %2202 = vmatprep.subr.bf16.mxu0 %v2346_v44 }
 0x304   : > { %2203 = vmatpush3.bf16.msra.mxu0 %v2287_v63  ;;  %v2296_v63 = vld [vmem:[%s2829_s20 + $0x38] sm:$0xff]  }
 0x305   : > { %2204 = vmatprep.subr.bf16.mxu0 %v2346_v44 }
 0x308   : > { %2205 = vmatpush3.bf16.msra.mxu0 %v2288_v0  ;;  %v2055_v0 = vld [vmem:[%s2826_s17] ss:$0 sm:$0xff] }
 0x3be   : > { %v1390_v3 = vpop.f32.mrb[4].mxu0 }
 0x3bf   : > { %v1391_v4 = vadd.f32 %v2033_v2, %v1390_v3  ;;  %v2168_v5 = vpop.f32.mrb[5].mxu0 }
 0x3c0   : > { %v1393_v6 = vpop.f32.mrb[6].mxu0 }
 0x3c1   : > { %v1397_v7 = vrot.slane %v1391_v4, 4  ;;  %v1394_v8 = vadd.f32 %v2033_v2, %v1393_v6  ;;  %v2169_v9 = vpop.f32.mrb[7].mxu0 }
 0x3c3   : > { %v1398_v10 = vadd.f32 %v1397_v7, %v1391_v4  ;;  %v1403_v11 = vrot.slane %v1394_v8, 4 }
 0x3c5   : > { %v1399_v12 = vrot.slane %v1398_v10, 2  ;;  %v1404_v13 = vadd.f32 %v1403_v11, %v1394_v8 }
 0x3c7   : > { %v1400_v14 = vadd.f32 %v1399_v12, %v1398_v10  ;;  %v1405_v15 = vrot.slane %v1404_v13, 2 }
 0x3c9   : > { %v1401_v16 = vrot.slane %v1400_v14, 1  ;;  %v1406_v17 = vadd.f32 %v1405_v15, %v1404_v13 }
 0x3cb   : > { %v1402_v18 = vadd.f32 %v1401_v16, %v1400_v14  ;;  %v1407_v19 = vrot.slane %v1406_v17, 1 }
 0x3cd   : > { %v1409_v20 = vmul.f32 0.125, %v1402_v18  ;;  %v1408_v21 = vadd.f32 %v1407_v19, %v1406_v17 }
 0x3cf   : > { %v1411_v22 = vsub.f32 %v1391_v4, %v1409_v20  ;;  %v1410_v23 = vmul.f32 0.125, %v1408_v21 }
 0x3d1   : > { %v1413_v24 = vmul.f32 %v1411_v22, %v1411_v22  ;;  %v1412_v25 = vsub.f32 %v1394_v8, %v1410_v23 }
 0x3d3   : > { %v1415_v26 = vrot.slane %v1413_v24, 4  ;;  %v1414_v27 = vmul.f32 %v1412_v25, %v1412_v25 }
 0x3d5   : > { %v1416_v28 = vadd.f32 %v1415_v26, %v1413_v24  ;;  %v1421_v29 = vrot.slane %v1414_v27, 4 }
 0x3d7   : > { %v1417_v30 = vrot.slane %v1416_v28, 2  ;;  %v1422_v31 = vadd.f32 %v1421_v29, %v1414_v27 }
 0x3d9   : > { %v1418_v32 = vadd.f32 %v1417_v30, %v1416_v28  ;;  %v1423_v33 = vrot.slane %v1422_v31, 2 }
 0x3db   : > { %v1419_v34 = vrot.slane %v1418_v32, 1  ;;  %v1424_v35 = vadd.f32 %v1423_v33, %v1422_v31 }
 0x3dd   : > { %v1420_v36 = vadd.f32 %v1419_v34, %v1418_v32  ;;  %v1425_v37 = vrot.slane %v1424_v35, 1 }
 0x3df   : > { %v1427_v38 = vmul.f32 0.125, %v1420_v36  ;;  %v1426_v39 = vadd.f32 %v1425_v37, %v1424_v35 }
 0x3e1   : > { %v1430_v40 = vadd.f32 1e-05, %v1427_v38  ;;  %v1428_v41 = vmul.f32 0.125, %v1426_v39 }
 0x3e3   : > { %2301 = vrsqrt.f32 %v1430_v40  ;;  %v1431_v42 = vadd.f32 1e-05, %v1428_v41 }
 0x3e5   : > { %2303 = vrsqrt.f32 %v1431_v42 }
 0x3ed   : > { %v2302_v43 = vpop.eup %2301 }
 0x3ee   : > { %v1434_v46 = vmul.f32 %v2302_v43, %v1411_v22  ;;  %v2053_v43 = vld [vmem:[%s2823_s14] ss:$0 sm:$0xff] }
 0x3ef   : > { %v2304_v47 = vpop.eup %2303 }
 0x3f0   : > { %v1442_v49 = vmul.f32 %v2042_v45, %v1434_v46  ;;  %v1435_v50 = vmul.f32 %v2304_v47, %v1412_v25 }
 0x3f2   : > { %v1443_v51 = vmul.f32 %v2042_v45, %v1435_v50  ;;  %v1451_v52 = vadd.f32 %v2043_v48, %v1442_v49  ;;  %v2054_v49 = vld [vmem:[%s2824_s15] ss:$0 sm:$0xff] }
 0x3f4   : > { %v1452_v53 = vadd.f32 %v2043_v48, %v1443_v51  ;;  %v1453_v54 = vmax.f32 %v1451_v52, 0.0 }
 0x3f6   : > { %v1454_v55 = vmax.f32 %v1452_v53, 0.0 }
 0x3f8   : > { %v1455_v56 = vpack.c.bf16 %v1454_v55, %v1453_v54 }
 0x3fa   : > { %2187 = vmatmul.mubr.bf16.vlgmr.msra.gmra.mrb[4].mxu1 %v1455_v56  ;;  %v2289_v56 = vld [vmem:[%s2829_s20] sm:$0xff]  }
 0x3fb   : > { %2226 = vmatprep.mubr.msk.bf16.mxu1 %vm2347_vm10, %v2346_v44  ;;  %2211 = vmatpush3.bf16.msra.mxu1 %v2289_v56  ;;  %v2066_v56 = vld [vmem:[%s2830_s21] ss:$0 sm:$0xff] }
 0x3fc   : > { %2212 = vmatprep.subr.bf16.mxu1 %v2346_v44 }
 0x3ff   : > { %2213 = vmatpush3.bf16.msra.mxu1 %v2290_v57 }
 0x400   : > { %2214 = vmatprep.subr.bf16.mxu1 %v2346_v44 }
 0x403   : > { %2215 = vmatpush3.bf16.msra.mxu1 %v2291_v58 }
 0x404   : > { %2216 = vmatprep.subr.bf16.mxu1 %v2346_v44 }
 0x407   : > { %2217 = vmatpush3.bf16.msra.mxu1 %v2292_v59 }
 0x408   : > { %2218 = vmatprep.subr.bf16.mxu1 %v2346_v44 }
 0x40b   : > { %2219 = vmatpush3.bf16.msra.mxu1 %v2293_v60 }
 0x40c   : > { %2220 = vmatprep.subr.bf16.mxu1 %v2346_v44 }
 0x40f   : > { %2221 = vmatpush3.bf16.msra.mxu1 %v2294_v61 }
 0x410   : > { %2222 = vmatprep.subr.bf16.mxu1 %v2346_v44 }
 0x413   : > { %2223 = vmatpush3.bf16.msra.mxu1 %v2295_v62 }
 0x414   : > { %2224 = vmatprep.subr.bf16.mxu1 %v2346_v44 }
 0x417   : > { %2225 = vmatpush3.bf16.msra.mxu1 %v2296_v63 }
 0x4cd   : > { %v1561_v2 = vpop.f32.mrb[4].mxu1 }
 0x4ce   : > { %v1562_v3 = vadd.f32 %v2044_v1, %v1561_v2  ;;  %v2188_v4 = vpop.f32.mrb[5].mxu1 }
 0x4cf   : > { %v1564_v5 = vpop.f32.mrb[6].mxu1 }
 0x4d0   : > { %v1568_v6 = vrot.slane %v1562_v3, 4  ;;  %v1565_v7 = vadd.f32 %v2044_v1, %v1564_v5  ;;  %v2189_v8 = vpop.f32.mrb[7].mxu1 }
 0x4d2   : > { %v1569_v9 = vadd.f32 %v1568_v6, %v1562_v3  ;;  %v1574_v10 = vrot.slane %v1565_v7, 4 }
 0x4d4   : > { %v1570_v11 = vrot.slane %v1569_v9, 2  ;;  %v1575_v12 = vadd.f32 %v1574_v10, %v1565_v7 }
 0x4d6   : > { %v1571_v13 = vadd.f32 %v1570_v11, %v1569_v9  ;;  %v1576_v14 = vrot.slane %v1575_v12, 2 }
 0x4d8   : > { %v1572_v15 = vrot.slane %v1571_v13, 1  ;;  %v1577_v16 = vadd.f32 %v1576_v14, %v1575_v12 }
 0x4da   : > { %v1573_v17 = vadd.f32 %v1572_v15, %v1571_v13  ;;  %v1578_v18 = vrot.slane %v1577_v16, 1 }
 0x4dc   : > { %v1580_v19 = vmul.f32 0.125, %v1573_v17  ;;  %v1579_v20 = vadd.f32 %v1578_v18, %v1577_v16 }
 0x4de   : > { %v1582_v21 = vsub.f32 %v1562_v3, %v1580_v19  ;;  %v1581_v22 = vmul.f32 0.125, %v1579_v20 }
 0x4e0   : > { %v1584_v23 = vmul.f32 %v1582_v21, %v1582_v21  ;;  %v1583_v24 = vsub.f32 %v1565_v7, %v1581_v22 }
 0x4e2   : > { %v1586_v25 = vrot.slane %v1584_v23, 4  ;;  %v1585_v26 = vmul.f32 %v1583_v24, %v1583_v24 }
 0x4e4   : > { %v1587_v27 = vadd.f32 %v1586_v25, %v1584_v23  ;;  %v1592_v28 = vrot.slane %v1585_v26, 4 }
 0x4e6   : > { %v1588_v29 = vrot.slane %v1587_v27, 2  ;;  %v1593_v30 = vadd.f32 %v1592_v28, %v1585_v26 }
 0x4e8   : > { %v1589_v31 = vadd.f32 %v1588_v29, %v1587_v27  ;;  %v1594_v32 = vrot.slane %v1593_v30, 2 }
 0x4ea   : > { %v1590_v33 = vrot.slane %v1589_v31, 1  ;;  %v1595_v34 = vadd.f32 %v1594_v32, %v1593_v30 }
 0x4ec   : > { %v1591_v35 = vadd.f32 %v1590_v33, %v1589_v31  ;;  %v1596_v36 = vrot.slane %v1595_v34, 1 }
 0x4ee   : > { %v1598_v37 = vmul.f32 0.125, %v1591_v35  ;;  %v1597_v38 = vadd.f32 %v1596_v36, %v1595_v34 }
 0x4f0   : > { %v1601_v39 = vadd.f32 1e-05, %v1598_v37  ;;  %v1599_v40 = vmul.f32 0.125, %v1597_v38 }
 0x4f2   : > { %2305 = vrsqrt.f32 %v1601_v39  ;;  %v1602_v41 = vadd.f32 1e-05, %v1599_v40 }
 0x4f4   : > { %2307 = vrsqrt.f32 %v1602_v41  ;;  %v2064_v41 = vld [vmem:[%s2827_s18] ss:$0 sm:$0xff] }
 0x4fc   : > { %v2306_v42 = vpop.eup %2305 }
 0x4fd   : > { %v1605_v45 = vmul.f32 %v2306_v42, %v1582_v21 }
 0x4fe   : > { %v2308_v46 = vpop.eup %2307 }
 0x4ff   : > { %v1606_v47 = vmul.f32 %v2308_v46, %v1583_v24  ;;  %v1613_v48 = vmul.f32 %v2053_v43, %v1605_v45  ;;  %v2065_v45 = vld [vmem:[%s2828_s19] ss:$0 sm:$0xff] }
 0x501   : > { %v1614_v50 = vmul.f32 %v2053_v43, %v1606_v47  ;;  %v2741_v51 = vadd.f32 %v2054_v49, %v1613_v48 }
 0x503   : > { %v2743_v52 = vadd.f32 %v2054_v49, %v1614_v50  ;;  %v1937_v55 = vmul.f32 %v2741_v51, %v2741_v51 }
 0x505   : > { %v1916_v53 = vmul.f32 %v2743_v52, %v2743_v52  ;;  %v1624_v54 = vpack.c.bf16 %v2743_v52, %v2741_v51 }
 0x507   : > { %1917 = vadd.xlane.f32.xlu1 %v1916_v53  ;;  %2207 = vmatmul.mubr.bf16.vlgmr.msra.gmra.mrb[8].mxu0 %v1624_v54 }
 0x50b   : > { %1938 = vadd.xlane.f32.xlu1 %v1937_v55 }
 0x5da   : > { %v1730_v1 = vpop.f32.mrb[8].mxu0 }
 0x5db   : > { %v1731_v2 = vadd.f32 %v2055_v0, %v1730_v1  ;;  %v2208_v3 = vpop.f32.mrb[9].mxu0 }
 0x5dc   : > { %v1733_v4 = vpop.f32.mrb[10].mxu0  ;;  %v1918_v3 = vpop.xlane.xlu1 %1917 }
 0x5dd   : > { %v1737_v5 = vrot.slane %v1731_v2, 4  ;;  %v1734_v6 = vadd.f32 %v2055_v0, %v1733_v4  ;;  %v2209_v7 = vpop.f32.mrb[11].mxu0 }
 0x5df   : > { %v1738_v8 = vadd.f32 %v1737_v5, %v1731_v2  ;;  %v1743_v9 = vrot.slane %v1734_v6, 4  ;;  %v1919_v5 = vmax.f32 %v1918_v3, 1e-16 }
 0x5e0   : > { %v1939_v7 = vpop.xlane.xlu1 %1938 }
 0x5e1   : > { %v1739_v10 = vrot.slane %v1738_v8, 2  ;;  %v1744_v11 = vadd.f32 %v1743_v9, %v1734_v6  ;;  %v1940_v9 = vmax.f32 %v1939_v7, 1e-16 }
 0x5e3   : > { %v1740_v12 = vadd.f32 %v1739_v10, %v1738_v8  ;;  %v1745_v13 = vrot.slane %v1744_v11, 2 }
 0x5e5   : > { %v1741_v14 = vrot.slane %v1740_v12, 1  ;;  %v1746_v44 = vadd.f32 %v1745_v13, %v1744_v11 }
 0x5e7   : > { %v1742_v15 = vadd.f32 %v1741_v14, %v1740_v12  ;;  %v1747_v16 = vrot.slane %v1746_v44, 1 }
 0x5e9   : > { %v1749_v17 = vmul.f32 0.125, %v1742_v15  ;;  %v1748_v18 = vadd.f32 %v1747_v16, %v1746_v44 }
 0x5eb   : > { %v1751_v19 = vsub.f32 %v1731_v2, %v1749_v17  ;;  %v1750_v20 = vmul.f32 0.125, %v1748_v18 }
 0x5ed   : > { %v1753_v21 = vmul.f32 %v1751_v19, %v1751_v19  ;;  %v1752_v22 = vsub.f32 %v1734_v6, %v1750_v20 }
 0x5ef   : > { %v1755_v23 = vrot.slane %v1753_v21, 4  ;;  %v1754_v24 = vmul.f32 %v1752_v22, %v1752_v22 }
 0x5f1   : > { %v1756_v25 = vadd.f32 %v1755_v23, %v1753_v21  ;;  %v1761_v26 = vrot.slane %v1754_v24, 4 }
 0x5f3   : > { %v1757_v27 = vrot.slane %v1756_v25, 2  ;;  %v1762_v28 = vadd.f32 %v1761_v26, %v1754_v24 }
 0x5f5   : > { %v1758_v29 = vadd.f32 %v1757_v27, %v1756_v25  ;;  %v1763_v30 = vrot.slane %v1762_v28, 2 }
 0x5f7   : > { %v1759_v31 = vrot.slane %v1758_v29, 1  ;;  %v1764_v32 = vadd.f32 %v1763_v30, %v1762_v28 }
 0x5f9   : > { %v1760_v33 = vadd.f32 %v1759_v31, %v1758_v29  ;;  %v1765_v34 = vrot.slane %v1764_v32, 1 }
 0x5fb   : > { %v1767_v35 = vmul.f32 0.125, %v1760_v33  ;;  %v1766_v36 = vadd.f32 %v1765_v34, %v1764_v32 }
 0x5fd   : > { %v1770_v37 = vadd.f32 1e-05, %v1767_v35  ;;  %v1768_v38 = vmul.f32 0.125, %v1766_v36 }
 0x5ff   : > { %2309 = vrsqrt.f32 %v1770_v37  ;;  %v1771_v39 = vadd.f32 1e-05, %v1768_v38 }
 0x601   : > { %2311 = vrsqrt.f32 %v1771_v39 }
 0x609   : > { %v2310_v40 = vpop.eup %2309 }
 0x60a   : > { %v1774_v42 = vmul.f32 %v2310_v40, %v1751_v19 }
 0x60b   : > { %v2312_v43 = vpop.eup %2311 }
 0x60c   : > { %v1782_v46 = vmul.f32 %v2064_v41, %v1774_v42  ;;  %v1775_v47 = vmul.f32 %v2312_v43, %v1752_v22 }
 0x60e   : > { %v1783_v48 = vmul.f32 %v2064_v41, %v1775_v47  ;;  %v1791_v49 = vadd.f32 %v2065_v45, %v1782_v46 }
 0x610   : > { %v1792_v50 = vadd.f32 %v2065_v45, %v1783_v48  ;;  %v1793_v53 = vmax.f32 %v1791_v49, 0.0 }
 0x612   : > { %v1794_v54 = vmax.f32 %v1792_v50, 0.0 }
 0x614   : > { %v1795_v55 = vpack.c.bf16 %v1794_v54, %v1793_v53 }
 0x616   : > { %2227 = vmatmul.mubr.bf16.vlgmr.msra.gmra.mrb[8].mxu1 %v1795_v55 }
 0x6e9   : > { %v1901_v57 = vpop.f32.mrb[8].mxu1 }
 0x6ea   : > { %v1902_v58 = vadd.f32 %v2066_v56, %v1901_v57  ;;  %v2228_v59 = vpop.f32.mrb[9].mxu1 }
 0x6eb   : > { %v1904_v60 = vpop.f32.mrb[10].mxu1 }
 0x6ec   : > { %v1905_v61 = vadd.f32 %v2066_v56, %v1904_v60  ;;  %v2229_v62 = vpop.f32.mrb[11].mxu1  ;;  %v1911_v63 = vmul.f32 %v1902_v58, %v1902_v58  ;;  %v1908_v2 = vmul.f32 %v1902_v58, %v2743_v52 }
 0x6ee   : > { %1912 = vadd.xlane.f32.xlu0 %v1911_v63  ;;  %v1929_v0 = vmul.f32 %v1905_v61, %v2741_v51  ;;  %v1932_v1 = vmul.f32 %v1905_v61, %v1905_v61 }
 0x6f0   : > { %1930 = vadd.xlane.f32.xlu1 %v1929_v0 }
 0x6f2   : > { %1933 = vadd.xlane.f32.xlu0 %v1932_v1 }
 0x6f6   : > { %1909 = vadd.xlane.f32.xlu0 %v1908_v2 }
 0x77b   : > { %v1913_v4 = vpop.xlane.xlu0 %1912 }
 0x77c   : > { %v1914_v6 = vmax.f32 %v1913_v4, 1e-16 }
 0x77d   : > { %v1931_v52 = vpop.xlane.xlu1 %1930 }
 0x77e   : > { %2313 = vrsqrt.f32 %v1914_v6 }
 0x77f   : > { %v1934_v8 = vpop.xlane.xlu0 %1933  ;;  %2315 = vrsqrt.f32 %v1919_v5 }
 0x780   : > { %v1935_v10 = vmax.f32 %v1934_v8, 1e-16 }
 0x782   : > { %2317 = vrsqrt.f32 %v1935_v10 }
 0x783   : > { %2319 = vrsqrt.f32 %v1940_v9  ;;  %v1910_v51 = vpop.xlane.xlu0 %1909 }
 0x788   : > { %v2314_v11 = vpop.eup %2313 }
 0x789   : > { %v1921_v12 = vmul.f32 %v2314_v11, %v1910_v51  ;;  %v2316_v13 = vpop.eup %2315 }
 0x78b   : > { %v1922_v14 = vmul.f32 %v2316_v13, %v1921_v12 }
 0x78c   : > { %v2318_v44 = vpop.eup %2317 }
 0x78d   : > { %v1942_v15 = vmul.f32 %v2318_v44, %v1931_v52  ;;  %v1923_v16 = vrot.slane %v1922_v14, 4  ;;  %v2320_v17 = vpop.eup %2319 }
 0x78f   : > { %v1943_v18 = vmul.f32 %v2320_v17, %v1942_v15  ;;  %v1924_v19 = vadd.f32 %v1923_v16, %v1922_v14 }
 0x791   : > { %v1944_v20 = vrot.slane %v1943_v18, 4  ;;  %v1925_v21 = vrot.slane %v1924_v19, 2 }
 0x793   : > { %v1945_v22 = vadd.f32 %v1944_v20, %v1943_v18  ;;  %v1926_v23 = vadd.f32 %v1925_v21, %v1924_v19 }
 0x795   : > { %v1946_v24 = vrot.slane %v1945_v22, 2  ;;  %v1927_v25 = vrot.slane %v1926_v23, 1 }
 0x797   : > { %v1947_v26 = vadd.f32 %v1946_v24, %v1945_v22  ;;  %v1928_v28 = vadd.f32 %v1927_v25, %v1926_v23 }
 0x799   : > { %v1948_v27 = vrot.slane %v1947_v26, 1 }
 0x79b   : > { %v1949_v29 = vadd.f32 %v1948_v27, %v1947_v26 }
 0x79d   : > { %v1950_v30 = vadd.f32 %v1949_v29, %v1928_v28 }
 0x79f   : > { %v1951_v31 = vsub.f32 0.0, %v1950_v30 }
 0x7a1   : > { %v1952_v32 = vmul.f32 0.0625, %v1951_v31 }
 0x7a3   : > { %1953 = vst [vmem:[%s2831_s22] sm:$0xff] %v1952_v32 }
 0x7a4 PF: > { %s2852_s24 = sld [smem:[#allocation5_spill]]  ;;  %p29_p10 = scmp.ge.s32.totalorder %s2480_s4, 4  }
 0x7a5   : > { %s2853_s3 = smov %s2339_s28  ;;  %s2855_s29 = smov %s2480_s4 }
 0x7a6   :  { %31 = sbr.rel (!%p29_p10) target bundleno = 10 (0xa), region = 237 }
 0x7aa   : > { %s2854_s28 = smov %s2852_s24 }

</bundles_post_ra>
